<compile_context>
chip_gen: v7x
topology: tpu7x:2x2x1
jax: 0.10.0
libtpu: 0.0.40
codegen_flags: <defaults>
</compile_context>

<pallas_src>
import functools
import numpy as np
import jax
import jax.numpy as jnp
from jax import lax
from jax.experimental import pallas as pl
from jax.experimental.pallas import tpu as pltpu


def gaussian_1d(kernel_size, sigma=2.0):
    m = (kernel_size - 1) / 2.0
    x = np.arange(kernel_size, dtype=np.float64)
    g = np.exp(-((x - m) ** 2) / (2.0 * sigma ** 2))
    g = g / g.sum()
    return g.astype(np.float32)


def _banded_blur_matrix(n, kernel_size, sigma):
    # B[i, y] = g[i - y + p] for |i - y| <= p : 1-D gaussian blur, zero padded.
    g = gaussian_1d(kernel_size, sigma)
    p = kernel_size // 2
    B = np.zeros((n, n), dtype=np.float32)
    for y in range(n):
        for d in range(kernel_size):
            i = y + d - p
            if 0 <= i < n:
                B[i, y] += g[d]
    return B


def _blur_scatter_matrix(H, W, kernel_size, sigma, Lp):
    """(H*W, Lp) matrix: 2-D gaussian blur (zero pad) of an (H, W) plane,
    scattered into the row-flattened (H+2, W+2) zero-padded plane layout."""
    Wp = W + 2
    Bh = _banded_blur_matrix(H, kernel_size, sigma)      # (H, H)  [j, y]
    Bw = _banded_blur_matrix(W, kernel_size, sigma)      # (W, W)  [i, x]
    K2 = np.kron(Bh, Bw)                                 # (H*W, H*W) [(j,i),(y,x)]
    M = np.zeros((H * W, Lp), dtype=np.float32)
    cols = ((np.arange(H)[:, None] + 1) * Wp
            + (np.arange(W)[None, :] + 1)).reshape(-1)   # positions of real data
    M[:, cols] = K2
    return M


# ------------------------------ Pallas kernel ------------------------------ #

def _head_calibration_kernel(maps_ref, fea_ref, blur_ref, w_ref, b_ref, o_ref,
                             *, C2, Wp, Nout_pad):
    # maps_ref: (1, C2, H*W)      interleaved class maps [unc_c, pred_c, ...]
    # fea_ref:  (1, F, Lp)        features, row-flattened zero-padded plane
    # blur_ref: (H*W, Lp)         gaussian blur + flatten/pad scatter matrix
    # w_ref:    (Cout_p, 9*C2*F)  3x3 conv weights, tap-major flattened
    # b_ref:    (Cout_p, 1)
    # o_ref:    (1, Cout_p, Nout_pad)
    #
    # 1) soft maps: 2-D gaussian blur as ONE MXU matmul whose output is already
    #    in the flattened zero-padded layout used by the conv taps below.
    smap = jnp.dot(maps_ref[0], blur_ref[...],
                   preferred_element_type=jnp.float32)               # (C2, Lp)
    # 2) feature modulation fea*soft_map + fea, computed ONCE (not per tap).
    fea = fea_ref[0]                                                  # (F, Lp)
    one_plus = 1.0 + smap                                             # (C2, Lp)
    mod = jnp.concatenate(
        [fea * one_plus[c2:c2 + 1, :] for c2 in range(C2)], axis=0)   # (C2*F, Lp)
    # 3) im2col over the 9 conv taps (contiguous lane slices of mod) ->
    #    a single K = 9*C2*F matmul that fills the MXU depth.
    cols = [mod[:, ky * Wp + kx: ky * Wp + kx + Nout_pad]
            for ky in range(3) for kx in range(3)]
    im2col = jnp.concatenate(cols, axis=0)                            # (9*C2*F, Nout_pad)
    logits = jnp.dot(w_ref[...], im2col,
                     preferred_element_type=jnp.float32) + b_ref[...]
    # 4) sigmoid: exp and reciprocal both go to the EUP (off the VALU slots).
    o_ref[0] = pl.reciprocal(1.0 + jnp.exp(-logits), approx=True)


# -------------------------------- Wrapper ----------------------------------- #

def head_calibration_forward(uncertainty, preds, fea, head_w, head_b,
                             kernel_size=31, sigma=2.0):
    B, C, H, W = uncertainty.shape
    F = fea.shape[1]
    C2 = 2 * C
    Cout, Cin = head_w.shape[0], head_w.shape[1]
    assert Cin == C2 * F

    Wp = W + 2
    L = (H + 2) * Wp                         # flattened zero-padded plane length
    Nout = H * Wp                            # valid + junk output columns
    Nout_pad = ((Nout + 127) // 128) * 128   # lane-dense output width
    Lp = ((max(L, 2 * Wp + 2 + Nout_pad) + 127) // 128) * 128
    HW = H * W
    Cout_p = max(8, ((Cout + 7) // 8) * 8)
    K9 = 9 * C2 * F

    # interleaved class maps, matching torch.cat order:
    # [unc_c0, pred_c0, unc_c1, pred_c1, ...], spatial dims flattened into lanes.
    maps = jnp.stack([uncertainty, preds], axis=2).reshape(B, C2, HW)
    maps = maps.astype(jnp.float32)

    # features in the row-flattened zero-padded plane layout (zero border ->
    # the modulated product is exactly zero wherever the conv pads).
    fea_p = jnp.pad(fea.astype(jnp.float32), ((0, 0), (0, 0), (1, 1), (1, 1)))
    fea_flat = jnp.pad(fea_p.reshape(B, F, L), ((0, 0), (0, 0), (0, Lp - L)))

    # compile-time blur + scatter matrix (K = H*W, lane-dense N = Lp).
    blur_mat = jnp.asarray(_blur_scatter_matrix(H, W, kernel_size, sigma, Lp))

    # conv weights flattened tap-major: K index = (ky*3 + kx)*Cin + cin.
    w_flat = jnp.transpose(head_w, (0, 2, 3, 1)).reshape(Cout, K9)
    w_flat = jnp.pad(w_flat, ((0, Cout_p - Cout), (0, 0))).astype(jnp.float32)
    b_r = jnp.pad(head_b, (0, Cout_p - Cout)).reshape(Cout_p, 1).astype(jnp.float32)

    o_flat = pl.pallas_call(
        functools.partial(_head_calibration_kernel,
                          C2=C2, Wp=Wp, Nout_pad=Nout_pad),
        grid=(B,),
        in_specs=[
            pl.BlockSpec((1, C2, HW), lambda b: (b, 0, 0)),
            pl.BlockSpec((1, F, Lp), lambda b: (b, 0, 0)),
            # constant index_maps: blur matrix / weights / bias stay resident
            pl.BlockSpec((HW, Lp), lambda b: (0, 0)),
            pl.BlockSpec((Cout_p, K9), lambda b: (0, 0)),
            pl.BlockSpec((Cout_p, 1), lambda b: (0, 0)),
        ],
        out_specs=pl.BlockSpec((1, Cout_p, Nout_pad), lambda b: (b, 0, 0)),
        out_shape=jax.ShapeDtypeStruct((B, Cout_p, Nout_pad), jnp.float32),
        compiler_params=pltpu.CompilerParams(
            dimension_semantics=("parallel",),
            vmem_limit_bytes=32 * 1024 * 1024),
    )(maps, fea_flat, blur_mat, w_flat, b_r)

    # drop channel padding, lane padding and the 2 junk columns per row.
    o = o_flat[:, :Cout, :Nout].reshape(B, Cout, H, Wp)[:, :, :, :W]
    return o


# --------------------------- pure-JAX reference ----------------------------- #

def head_calibration_reference(uncertainty, preds, fea, head_w, head_b,
                               kernel_size=31, sigma=2.0):
    B, C, H, W = uncertainty.shape
    Fd = fea.shape[1]
    C2 = 2 * C
    p = kernel_size // 2
    g1 = gaussian_1d(kernel_size, sigma)
    g2d = jnp.asarray(np.outer(g1, g1), jnp.float32)
    maps = jnp.stack([uncertainty, preds], axis=2).reshape(B, C2, H, W)
    dw = jnp.broadcast_to(g2d, (C2, 1, kernel_size, kernel_size))
    smaps = lax.conv_general_dilated(
        maps, dw, (1, 1), ((p, p), (p, p)),
        dimension_numbers=('NCHW', 'OIHW', 'NCHW'),
        feature_group_count=C2, precision=lax.Precision.HIGHEST)
    fl = (fea[:, None] * (1.0 + smaps[:, :, None])).reshape(B, C2 * Fd, H, W)
    o = lax.conv_general_dilated(
        fl, head_w, (1, 1), ((1, 1), (1, 1)),
        dimension_numbers=('NCHW', 'OIHW', 'NCHW'),
        precision=lax.Precision.HIGHEST)
    return jax.nn.sigmoid(o + head_b[None, :, None, None])


# ----------------------------------- main ----------------------------------- #

if __name__ == "__main__":
    B, n_classes, n_fea, H, W = 2, 4, 8, 16, 16
    kernel_size = 7  # module default is 31; constructor arg, kept small here

    key = jax.random.PRNGKey(0)
    k1, k2, k3, k4, k5 = jax.random.split(key, 5)
    uncertainty = jax.random.uniform(k1, (B, n_classes, H, W), jnp.float32)
    preds = jax.random.uniform(k2, (B, n_classes, H, W), jnp.float32)
    fea = jax.random.normal(k3, (B, n_fea, H, W), jnp.float32)

    Cin = n_fea * n_classes * 2
    head_w = 0.05 * jax.random.normal(k4, (n_classes, Cin, 3, 3), jnp.float32)
    head_b = 0.05 * jax.random.normal(k5, (n_classes,), jnp.float32)

    out = head_calibration_forward(uncertainty, preds, fea, head_w, head_b,
                                   kernel_size=kernel_size)
    out = jax.block_until_ready(out)

    ref = head_calibration_reference(uncertainty, preds, fea, head_w, head_b,
                                     kernel_size=kernel_size)
    ref = jax.block_until_ready(ref)

    # Kernel matmuls run at default (single-pass) MXU precision while the
    # reference uses Precision.HIGHEST; allow bf16-pass-level tolerance on the
    # sigmoid outputs.
    np.testing.assert_allclose(np.asarray(out), np.asarray(ref),
                               rtol=1e-2, atol=1e-2)
    assert out.shape == (B, n_classes, H, W)
    print("KERNEL_OK")
</pallas_src>

<mosaic_0001>
module attributes {stable_mosaic.version = 11 : i64} {
  func.func @_head_calibration_kernel(%arg0: i32, %arg1: memref<1x8x256xf32, #tpu.memory_space<vmem>>, %arg2: memref<1x8x512xf32, #tpu.memory_space<vmem>>, %arg3: memref<256x512xf32, #tpu.memory_space<vmem>>, %arg4: memref<8x576xf32, #tpu.memory_space<vmem>>, %arg5: memref<8x1xf32, #tpu.memory_space<vmem>>, %arg6: memref<1x8x384xf32, #tpu.memory_space<vmem>>) attributes {dimension_semantics = [#tpu.dimension_semantics<parallel>], iteration_bounds = array<i64: 2>, scalar_prefetch = 0 : i64, scratch_operands = 0 : i64, tpu.core_type = #tpu.core_type<tc>, window_params = [{transform_indices = @transform_0, window_bounds = array<i64: 1, 8, 256>}, {transform_indices = @transform_1, window_bounds = array<i64: 1, 8, 512>}, {pipeline_mode = #tpu.pipeline_mode<synchronous>, transform_indices = @transform_2, window_bounds = array<i64: 256, 512>}, {pipeline_mode = #tpu.pipeline_mode<synchronous>, transform_indices = @transform_3, window_bounds = array<i64: 8, 576>}, {pipeline_mode = #tpu.pipeline_mode<synchronous>, transform_indices = @transform_4, window_bounds = array<i64: 8, 1>}, {transform_indices = @transform_5, window_bounds = array<i64: 1, 8, 384>}]} {
    %c0 = arith.constant 0 : index
    %c0_0 = arith.constant 0 : index
    %c0_1 = arith.constant 0 : index
    %0 = vector.load %arg1[%c0, %c0_0, %c0_1] : memref<1x8x256xf32, #tpu.memory_space<vmem>>, vector<1x8x256xf32>
    %1 = vector.shape_cast %0 : vector<1x8x256xf32> to vector<8x256xf32>
    %c0_2 = arith.constant 0 : index
    %c0_3 = arith.constant 0 : index
    %2 = vector.load %arg3[%c0_2, %c0_3] : memref<256x512xf32, #tpu.memory_space<vmem>>, vector<256x512xf32>
    %cst = arith.constant dense<0.000000e+00> : vector<8x512xf32>
    %3 = tpu.matmul %1, %2, %cst {dimension_numbers = #tpu.dot_dimension_numbers<[1], [0], [0], [1], [0, 0, 1, 1], [], []>} : vector<8x256xf32>, vector<256x512xf32>, vector<8x512xf32> -> vector<8x512xf32>
    %c0_4 = arith.constant 0 : index
    %c0_5 = arith.constant 0 : index
    %c0_6 = arith.constant 0 : index
    %4 = vector.load %arg2[%c0_4, %c0_5, %c0_6] : memref<1x8x512xf32, #tpu.memory_space<vmem>>, vector<1x8x512xf32>
    %5 = vector.shape_cast %4 : vector<1x8x512xf32> to vector<8x512xf32>
    %cst_7 = arith.constant 1.000000e+00 : f32
    %6 = vector.broadcast %cst_7 : f32 to vector<8x512xf32>
    %7 = arith.addf %6, %3 : vector<8x512xf32>
    %8 = vector.extract_strided_slice %7 {offsets = [0, 0], sizes = [1, 512], strides = [1, 1]} : vector<8x512xf32> to vector<1x512xf32>
    %9 = vector.broadcast %8 : vector<1x512xf32> to vector<8x512xf32>
    %10 = arith.mulf %5, %9 : vector<8x512xf32>
    %11 = vector.extract_strided_slice %7 {offsets = [1, 0], sizes = [1, 512], strides = [1, 1]} : vector<8x512xf32> to vector<1x512xf32>
    %12 = vector.broadcast %11 : vector<1x512xf32> to vector<8x512xf32>
    %13 = arith.mulf %5, %12 : vector<8x512xf32>
    %14 = vector.extract_strided_slice %7 {offsets = [2, 0], sizes = [1, 512], strides = [1, 1]} : vector<8x512xf32> to vector<1x512xf32>
    %15 = vector.broadcast %14 : vector<1x512xf32> to vector<8x512xf32>
    %16 = arith.mulf %5, %15 : vector<8x512xf32>
    %17 = vector.extract_strided_slice %7 {offsets = [3, 0], sizes = [1, 512], strides = [1, 1]} : vector<8x512xf32> to vector<1x512xf32>
    %18 = vector.broadcast %17 : vector<1x512xf32> to vector<8x512xf32>
    %19 = arith.mulf %5, %18 : vector<8x512xf32>
    %20 = vector.extract_strided_slice %7 {offsets = [4, 0], sizes = [1, 512], strides = [1, 1]} : vector<8x512xf32> to vector<1x512xf32>
    %21 = vector.broadcast %20 : vector<1x512xf32> to vector<8x512xf32>
    %22 = arith.mulf %5, %21 : vector<8x512xf32>
    %23 = vector.extract_strided_slice %7 {offsets = [5, 0], sizes = [1, 512], strides = [1, 1]} : vector<8x512xf32> to vector<1x512xf32>
    %24 = vector.broadcast %23 : vector<1x512xf32> to vector<8x512xf32>
    %25 = arith.mulf %5, %24 : vector<8x512xf32>
    %26 = vector.extract_strided_slice %7 {offsets = [6, 0], sizes = [1, 512], strides = [1, 1]} : vector<8x512xf32> to vector<1x512xf32>
    %27 = vector.broadcast %26 : vector<1x512xf32> to vector<8x512xf32>
    %28 = arith.mulf %5, %27 : vector<8x512xf32>
    %29 = vector.extract_strided_slice %7 {offsets = [7, 0], sizes = [1, 512], strides = [1, 1]} : vector<8x512xf32> to vector<1x512xf32>
    %30 = vector.broadcast %29 : vector<1x512xf32> to vector<8x512xf32>
    %31 = arith.mulf %5, %30 : vector<8x512xf32>
    %32 = tpu.concatenate %10, %13, %16, %19, %22, %25, %28, %31 in 0 : vector<8x512xf32>, vector<8x512xf32>, vector<8x512xf32>, vector<8x512xf32>, vector<8x512xf32>, vector<8x512xf32>, vector<8x512xf32>, vector<8x512xf32> -> vector<64x512xf32>
    %33 = vector.extract_strided_slice %32 {offsets = [0, 0], sizes = [64, 384], strides = [1, 1]} : vector<64x512xf32> to vector<64x384xf32>
    %34 = vector.extract_strided_slice %32 {offsets = [0, 1], sizes = [64, 384], strides = [1, 1]} : vector<64x512xf32> to vector<64x384xf32>
    %35 = vector.extract_strided_slice %32 {offsets = [0, 2], sizes = [64, 384], strides = [1, 1]} : vector<64x512xf32> to vector<64x384xf32>
    %36 = vector.extract_strided_slice %32 {offsets = [0, 18], sizes = [64, 384], strides = [1, 1]} : vector<64x512xf32> to vector<64x384xf32>
    %37 = vector.extract_strided_slice %32 {offsets = [0, 19], sizes = [64, 384], strides = [1, 1]} : vector<64x512xf32> to vector<64x384xf32>
    %38 = vector.extract_strided_slice %32 {offsets = [0, 20], sizes = [64, 384], strides = [1, 1]} : vector<64x512xf32> to vector<64x384xf32>
    %39 = vector.extract_strided_slice %32 {offsets = [0, 36], sizes = [64, 384], strides = [1, 1]} : vector<64x512xf32> to vector<64x384xf32>
    %40 = vector.extract_strided_slice %32 {offsets = [0, 37], sizes = [64, 384], strides = [1, 1]} : vector<64x512xf32> to vector<64x384xf32>
    %41 = vector.extract_strided_slice %32 {offsets = [0, 38], sizes = [64, 384], strides = [1, 1]} : vector<64x512xf32> to vector<64x384xf32>
    %42 = tpu.concatenate %33, %34, %35, %36, %37, %38, %39, %40, %41 in 0 : vector<64x384xf32>, vector<64x384xf32>, vector<64x384xf32>, vector<64x384xf32>, vector<64x384xf32>, vector<64x384xf32>, vector<64x384xf32>, vector<64x384xf32>, vector<64x384xf32> -> vector<576x384xf32>
    %c0_8 = arith.constant 0 : index
    %c0_9 = arith.constant 0 : index
    %43 = vector.load %arg4[%c0_8, %c0_9] : memref<8x576xf32, #tpu.memory_space<vmem>>, vector<8x576xf32>
    %cst_10 = arith.constant dense<0.000000e+00> : vector<8x384xf32>
    %44 = tpu.matmul %43, %42, %cst_10 {dimension_numbers = #tpu.dot_dimension_numbers<[1], [0], [0], [1], [0, 0, 1, 1], [], []>} : vector<8x576xf32>, vector<576x384xf32>, vector<8x384xf32> -> vector<8x384xf32>
    %c0_11 = arith.constant 0 : index
    %c0_12 = arith.constant 0 : index
    %45 = vector.load %arg5[%c0_11, %c0_12] : memref<8x1xf32, #tpu.memory_space<vmem>>, vector<8x1xf32>
    %46 = vector.broadcast %45 : vector<8x1xf32> to vector<8x384xf32>
    %47 = arith.addf %44, %46 : vector<8x384xf32>
    %cst_13 = arith.constant 0.000000e+00 : f32
    %48 = vector.broadcast %cst_13 : f32 to vector<8x384xf32>
    %49 = arith.subf %48, %47 : vector<8x384xf32>
    %50 = math.exp %49 : vector<8x384xf32>
    %cst_14 = arith.constant 1.000000e+00 : f32
    %51 = vector.broadcast %cst_14 : f32 to vector<8x384xf32>
    %52 = arith.addf %51, %50 : vector<8x384xf32>
    %53 = tpu.reciprocal %52 {approx = true} : vector<8x384xf32> -> vector<8x384xf32>
    %c0_15 = arith.constant 0 : index
    %c0_16 = arith.constant 0 : index
    %c0_17 = arith.constant 0 : index
    %54 = vector.load %arg6[%c0_15, %c0_16, %c0_17] : memref<1x8x384xf32, #tpu.memory_space<vmem>>, vector<1x8x384xf32>
    %55 = vector.shape_cast %54 : vector<1x8x384xf32> to vector<8x384xf32>
    %56 = vector.shape_cast %53 : vector<8x384xf32> to vector<1x8x384xf32>
    tpu.vector_store %arg6[%c0_15, %c0_16, %c0_17], %56 {strides = array<i32>} : memref<1x8x384xf32, #tpu.memory_space<vmem>>, vector<1x8x384xf32>,
    return
  }
  func.func @transform_0(%arg0: i32) -> (i32, i32, i32) {
    %c0_i32 = arith.constant 0 : i32
    %c0_i32_0 = arith.constant 0 : i32
    %c0_i32_1 = arith.constant 0 : i32
    return %arg0, %c0_i32, %c0_i32_0 : i32, i32, i32
  }
  func.func @transform_1(%arg0: i32) -> (i32, i32, i32) {
    %c0_i32 = arith.constant 0 : i32
    %c0_i32_0 = arith.constant 0 : i32
    %c0_i32_1 = arith.constant 0 : i32
    return %arg0, %c0_i32, %c0_i32_0 : i32, i32, i32
  }
  func.func @transform_2(%arg0: i32) -> (i32, i32) {
    %c0_i32 = arith.constant 0 : i32
    %c0_i32_0 = arith.constant 0 : i32
    %c0_i32_1 = arith.constant 0 : i32
    return %c0_i32, %c0_i32_0 : i32, i32
  }
  func.func @transform_3(%arg0: i32) -> (i32, i32) {
    %c0_i32 = arith.constant 0 : i32
    %c0_i32_0 = arith.constant 0 : i32
    %c0_i32_1 = arith.constant 0 : i32
    return %c0_i32, %c0_i32_0 : i32, i32
  }
  func.func @transform_4(%arg0: i32) -> (i32, i32) {
    %c0_i32 = arith.constant 0 : i32
    %c0_i32_0 = arith.constant 0 : i32
    %c0_i32_1 = arith.constant 0 : i32
    return %c0_i32, %c0_i32_0 : i32, i32
  }
  func.func @transform_5(%arg0: i32) -> (i32, i32, i32) {
    %c0_i32 = arith.constant 0 : i32
    %c0_i32_0 = arith.constant 0 : i32
    %c0_i32_1 = arith.constant 0 : i32
    return %arg0, %c0_i32, %c0_i32_0 : i32, i32, i32
  }
}

</mosaic_0001>

<bundles_post_ra>
// kernel: tpu_custom_call.1
= control target key start
LH: loop header
LB: loop body
LE: loop exit
PB: predicated region body
PF: predicated region fallthrough
CT: control target
= control target key end

     0   :  { %s5423_s0 = inlined_call_operand.hbm [shape: f32[2,8,256], index: 0, kind: input, shape index: {}]   ;;  %s5424_s1 = inlined_call_operand.hbm [shape: f32[2,8,512], index: 1, kind: input, shape index: {}]   ;;  %s5425_s2 = inlined_call_operand.hbm [shape: f32[256,512], index: 2, kind: input, shape index: {}]   ;;  %s5426_s3 = inlined_call_operand.hbm [shape: f32[8,576], index: 3, kind: input, shape index: {}]   ;;  %s5427_s4 = inlined_call_operand.vmem [shape: f32[8,1], index: 4, kind: input, shape index: {}]   ;;  %s5428_s5 = inlined_call_operand.hbm [shape: f32[2,8,384], index: 5, kind: output, shape index: {}]  }
   0x1   :  { %5475 = sst [smem:[#allocation41_spill]] %s5423_s0 }
   0x2   :  { %10 = vsyncpa [#allocation3], 0 }
   0x3   :  { %12 = vsyncpa [#allocation3 + $0x1], 0 }
   0x4   :  { %13 = vsyncpa [#allocation6], 0 }
   0x5   :  { %15 = vsyncpa [#allocation6 + $0x1], 0 }
   0x6   :  { %16 = vsyncpa [#allocation9], 0 }
   0x7   :  { %17 = vsyncpa [#allocation4], 0 }
   0x8   :  { %19 = vsyncpa [#allocation4 + $0x1], 0  ;;  %s3722_s18 = smov 0   ;;  %s3724_s19 = smov 0  }
   0x9   :  { %s3726_s20 = smov 0   ;;  %s3728_s21 = smov 0  }
   0xa LB: > { %s3743_s22 = sadd.s32 4294967295, %s3671_s21   ;;  %s2261_s23 = sadd.s32 4294967294, %s3671_s21   ;;  %s3671_s21 = sphi %s3728_s21, %s5582_s21   ;;  %s3667_s20 = sphi %s3726_s20, %s5581_s20   ;;  %s3663_s19 = sphi %s3724_s19, %s5580_s19   ;;  %s3659_s18 = sphi %s3722_s18, %s5579_s18  }
   0xb   : > { %p45_p0 = scmp.ne.s32.totalorder %s3663_s19, %s3659_s18  ;;  %p5429_p1 = scmp.eq.s32.totalorder %s3743_s22, 0 }
   0xc   : > { %p164_p3 = scmp.eq.s32.totalorder %s2261_s23, 1  ;;  %p2262_p5 = scmp.ge.s32.totalorder %s3671_s21, 1 }
   0xd   : > { %p3752_p4 = por %p5429_p1, %p45_p0  ;;  %p171_p7 = scmp.lt.s32.totalorder %s3671_s21, 3 }
   0xe   : > { %p3757_p6 = por %p164_p3, %p45_p0  ;;  %s3673_s27 = smov [#allocation7]  }
   0xf   : > { %s5476_s24 = scalar_select %p3752_p4, 1, 0 }
  0x10   : > { %s5477_s25 = scalar_select %p3757_p6, 1, 0 }
  0x11   : > { %p3762_p8 = pnand %p2262_p5, %p171_p7  ;;  %s183_s28 = sshll.u32 %s3673_s27, 4  ;;  %s3766_s28 = int_to_ptr.vmem [resolvable:$true] %s183_s28 }
  0x12   : > { %s3674_s30 = smov [#allocation8]   ;;  %s3477_s9 = scalar_lea.hbm %s5425_s2, 16384 }
  0x13   : > { %s5478_s26 = scalar_select %p3762_p8, 1, 0 }
  0x14   : > { %p2752_p9 = pneg %p3762_p8  ;;  %s197_s6 = sshll.u32 %s3674_s30, 4  ;;  %s3777_s6 = int_to_ptr.vmem [resolvable:$true] %s197_s6 }
  0x15   : > { %p3478_p12 = scmp.ne.s32.totalorder %s5425_s2, %s3477_s9  ;;  %p3484_p5 = scmp.lt.u32.totalorder %s3477_s9, %s5425_s2 }
  0x16   : > { %p3773_p11 = pnand %p2752_p9, %p5429_p1 }
  0x18   : > { %p3479_p13 = pneg %p3773_p11 }
  0x1a   : > { %p3480_p0 = pnand %p3479_p13, %p3478_p12 }
  0x1c   : > { %p3481_p3 = pneg %p3480_p0 }
  0x1e   : > { %p3486_p7 = pnand %p3484_p5, %p3481_p3 }
  0x20   : > { %3489 = shalt.err (!%p3486_p7)
}
  0x21   : > { %s3490_s14 = scalar_lea.vmem %s3766_s28, 16384  ;;  %p3498_p2 = scmp.lt.s32.totalorder %s3766_s28, %s3766_s28 }
  0x22   : > { %p3491_p9 = scmp.ne.s32.totalorder %s3766_s28, %s3490_s14  ;;  %p3499_p12 = scmp.lt.s32.totalorder %s3490_s14, %s3490_s14 }
  0x24   : > { %p3493_p10 = pnand %p3491_p9, %p3479_p13  ;;  %p3500_p0 = por %p3499_p12, %p3498_p2 }
  0x26   : > { %p3494_p1 = pneg %p3493_p10 }
  0x28   : > { %p3501_p6 = pnand %p3500_p0, %p3494_p1 }
  0x2a   : > { %3504 = shalt.err (!%p3501_p6)
}
  0x2b   : > { %s3675_s15 = smov 512   ;;  %s3676_s16 = smov 32  }
  0x2c   : > { %2755 = dma.hbm_to_vmem [thread:$0]  (!%p3773_p11), %s5425_s2, 16384, %s3766_s28, [#allocation6], %s3675_s15, %s3675_s15, %s3676_s16  }
  0x2d   : > { %s3505_s7 = scalar_lea.hbm %s5426_s3, 640 }
  0x2e   : > { %p3506_p2 = scmp.ne.s32.totalorder %s5426_s3, %s3505_s7  ;;  %p3512_p10 = scmp.lt.u32.totalorder %s3505_s7, %s5426_s3 }
  0x30   : > { %p3508_p1 = pnand %p3506_p2, %p3479_p13 }
  0x32   : > { %p3509_p6 = pneg %p3508_p1 }
  0x34   : > { %p3514_p3 = pnand %p3512_p10, %p3509_p6 }
  0x36   : > { %3517 = shalt.err (!%p3514_p3)
}
  0x37   : > { %s3518_s28 = scalar_lea.vmem %s3777_s6, 640  ;;  %p3526_p12 = scmp.lt.s32.totalorder %s3777_s6, %s3777_s6 }
  0x38   : > { %p3519_p5 = scmp.ne.s32.totalorder %s3777_s6, %s3518_s28  ;;  %p3527_p0 = scmp.lt.s32.totalorder %s3518_s28, %s3518_s28 }
  0x3a   : > { %p3521_p7 = pnand %p3519_p5, %p3479_p13  ;;  %p3528_p2 = por %p3527_p0, %p3526_p12 }
  0x3c   : > { %p3522_p9 = pneg %p3521_p7 }
  0x3e   : > { %p3529_p1 = pnand %p3528_p2, %p3522_p9 }
  0x40   : > { %3532 = shalt.err (!%p3529_p1)
}
  0x41   : > { %2758 = dma.hbm_to_vmem [thread:$0]  (!%p3773_p11), %s5426_s3, 640, %s3777_s6, [#allocation9]  }
  0x42   : > { %s3832_s14 = sadd.s32 1, %s3671_s21   ;;  %s32_s29 = sadd.s32 1, %s3667_s20 }
  0x43   : > { %s29_s15 = ssub.s32 %s3671_s21, %s3832_s14  ;;  %p39_p13 = scmp.ne.s32.totalorder %s3667_s20, %s3663_s19 }
  0x44   : > { %p30_p6 = scmp.eq.s32.totalorder %s29_s15, 0  ;;  %p40_p10 = scmp.eq.s32.totalorder %s3671_s21, 0 }
  0x45   : > { %p5480_p3 = scmp.eq.s32.totalorder %s3743_s22, 1  ;;  %p2772_p7 = scmp.lt.s32.totalorder %s3671_s21, 2 }
  0x46   : > { %s3848_s17 = scalar_select %p30_p6, %s3667_s20, %s32_s29  }
  0x47   : > { %p3842_p5 = por %p5480_p3, %p39_p13  ;;  %p41_p9 = por %p40_p10, %p39_p13 }
  0x48   : > { %s3851_s23 = sand.u32 1, %s3667_s20   ;;  %s2282_s27 = sshll.u32 %s3671_s21, 8 }
  0x49   : > { %s5481_s16 = scalar_select %p3842_p5, 1, 0 }
  0x4a   : > { %s2266_s6 = sshll.u32 %s3851_s23, 4  ;;  %s5482_s0 = sld [smem:[#allocation41_spill]] }
  0x4b   : > { %s215_s9 = scalar_lea.vmem [#allocation2], %s2266_s6  ;;  %p3862_p11 = pnand %p2772_p7, %p41_p9 }
  0x4c   : > { %s223_s10 = sshll.u32 %s215_s9, 4  ;;  %s230_s28 = sand.u32 1, %s3671_s21   ;;  %s3860_s10 = int_to_ptr.vmem [resolvable:$true] %s223_s10 }
  0x4d   : > { %s2269_s12 = sshll.u32 %s3851_s23, 5  ;;  %s212_s13 = scalar_lea.sflag [#allocation3], %s3851_s23 }
  0x4e   : > { %p3535_p0 = pneg %p3862_p11 }
  0x50   : > { %s3858_s8 = scalar_lea.hbm %s5482_s0, %s2282_s27  ;;  %s3538_s27 = scalar_lea.hbm %s5482_s0, 512 }
  0x51   : > { %s3533_s29 = scalar_lea.hbm %s3858_s8, 256  ;;  %p3539_p13 = scmp.lt.u32.totalorder %s3858_s8, %s5482_s0 }
  0x52   : > { %p3534_p12 = scmp.ne.s32.totalorder %s3858_s8, %s3533_s29  ;;  %p3540_p6 = scmp.lt.u32.totalorder %s3538_s27, %s3533_s29 }
  0x53   : > { %p3542_p3 = scmp.lt.u32.totalorder %s3533_s29, %s3858_s8 }
  0x54   : > { %p3536_p2 = pnand %p3535_p0, %p3534_p12  ;;  %p3541_p10 = por %p3540_p6, %p3539_p13 }
  0x56   : > { %p3537_p1 = pneg %p3536_p2  ;;  %p3543_p7 = por %p3542_p3, %p3541_p10 }
  0x58   : > { %p3544_p9 = pnand %p3543_p7, %p3537_p1 }
  0x5a   : > { %3547 = shalt.err (!%p3544_p9)
}
  0x5b   : > { %s3548_s9 = scalar_lea.vmem %s3860_s10, 256  ;;  %s3677_s15 = smov [#allocation2]  }
  0x5c   : > { %p3549_p12 = scmp.ne.s32.totalorder %s3860_s10, %s3548_s9  ;;  %s3553_s6 = sshll.u32 %s3677_s15, 4  ;;  %s3554_s6 = int_to_ptr.vmem [resolvable:$false] %s3553_s6 }
  0x5d   : > { %s3555_s30 = scalar_lea.vmem %s3554_s6, 512  ;;  %p3556_p4 = scmp.lt.s32.totalorder %s3860_s10, %s3554_s6 }
  0x5e   : > { %p3551_p2 = pnand %p3549_p12, %p3535_p0  ;;  %p3557_p13 = scmp.lt.s32.totalorder %s3555_s30, %s3548_s9 }
  0x60   : > { %p3552_p5 = pneg %p3551_p2  ;;  %p3558_p6 = por %p3557_p13, %p3556_p4 }
  0x62   : > { %p3559_p10 = pnand %p3558_p6, %p3552_p5 }
  0x64   : > { %3562 = shalt.err (!%p3559_p10)
}
  0x65   : > { %2762 = dma.hbm_to_vmem [thread:$0]  (!%p3862_p11), %s3858_s8, 256, %s3860_s10, %s212_s13  }
  0x66   : > { %s2283_s29 = sshll.u32 %s3671_s21, 9  ;;  %s234_s9 = scalar_lea.vmem [#allocation5], %s2269_s12 }
  0x67   : > { %s3898_s15 = scalar_lea.hbm %s5424_s1, %s2283_s29  ;;  %s242_s6 = sshll.u32 %s234_s9, 4  ;;  %s243_s6 = int_to_ptr.vmem [resolvable:$true] %s242_s6 }
  0x68   : > { %s231_s30 = scalar_lea.sflag [#allocation6], %s230_s28  ;;  %s3563_s0 = scalar_lea.hbm %s3898_s15, 512 }
  0x69   : > { %p3564_p4 = scmp.ne.s32.totalorder %s3898_s15, %s3563_s0  ;;  %s3568_s13 = scalar_lea.hbm %s5424_s1, 1024 }
  0x6a   : > { %p3569_p3 = scmp.lt.u32.totalorder %s3898_s15, %s5424_s1  ;;  %p3570_p7 = scmp.lt.u32.totalorder %s3568_s13, %s3563_s0 }
  0x6b   : > { %p3566_p5 = pnand %p3564_p4, %p3535_p0  ;;  %p3572_p12 = scmp.lt.u32.totalorder %s3563_s0, %s3898_s15 }
  0x6c   : > { %p3571_p9 = por %p3570_p7, %p3569_p3 }
  0x6d   : > { %p3567_p1 = pneg %p3566_p5 }
  0x6e   : > { %p3573_p2 = por %p3572_p12, %p3571_p9 }
  0x70   : > { %p3574_p13 = pnand %p3573_p2, %p3567_p1 }
  0x72   : > { %3577 = shalt.err (!%p3574_p13)
}
  0x73   : > { %s3578_s28 = scalar_lea.vmem %s243_s6, 512  ;;  %s3678_s12 = smov [#allocation5]  }
  0x74   : > { %p3579_p6 = scmp.ne.s32.totalorder %s243_s6, %s3578_s28  ;;  %s3583_s27 = sshll.u32 %s3678_s12, 4  ;;  %s3584_s27 = int_to_ptr.vmem [resolvable:$false] %s3583_s27 }
  0x75   : > { %s3585_s7 = scalar_lea.vmem %s3584_s27, 1024  ;;  %p3586_p5 = scmp.lt.s32.totalorder %s243_s6, %s3584_s27 }
  0x76   : > { %p3581_p10 = pnand %p3579_p6, %p3535_p0  ;;  %p3587_p8 = scmp.lt.s32.totalorder %s3585_s7, %s3578_s28 }
  0x78   : > { %p3582_p4 = pneg %p3581_p10  ;;  %p3588_p3 = por %p3587_p8, %p3586_p5 }
  0x7a   : > { %p3589_p7 = pnand %p3588_p3, %p3582_p4 }
  0x7c   : > { %3592 = shalt.err (!%p3589_p7)
}
  0x7d   : > { %2765 = dma.hbm_to_vmem [thread:$0]  (!%p3862_p11), %s3898_s15, 512, %s243_s6, %s231_s30  }
  0x7e   : > { %p5484_p1 = scmp.ne.s32.totalorder %s5478_s26, 0 }
  0x80   : > { %251 = sbr.rel (%p5484_p1) target bundleno = 1078 (0x436), region = 40 }
  0x87   : > { %s3926_s0 = sand.u32 1, %s3663_s19   ;;  %p5485_p8 = scmp.ne.s32.totalorder %s5476_s24, 0 }
  0x88   : > { %s2273_s9 = sshll.u32 %s3926_s0, 4  ;;  %s254_s8 = scalar_lea.sflag [#allocation3], %s3926_s0 }
  0x89   : > { %s3930_s10 = scalar_lea.vmem [#allocation2], %s2273_s9 }
  0x8a   : > { %3638 = dma.done.wait (%p5485_p8), %s254_s8, 256  }
  0x8b   : > { %3640 = vsyncadd (%p5485_p8), %s254_s8, 4294967040  ;;  %s262_s26 = sand.u32 1, %s3743_s22   ;;  %s2274_s11 = sshll.u32 %s3926_s0, 5 }
  0x8c   : > { %s263_s15 = scalar_lea.sflag [#allocation6], %s262_s26  ;;  %s3938_s6 = scalar_lea.vmem [#allocation5], %s2274_s11 }
  0x8d   : > { %3642 = dma.done.wait (%p5485_p8), %s263_s15, 512  }
  0x8e   : > { %3644 = vsyncadd (%p5485_p8), %s263_s15, 4294966784  ;;  %p5486_p11 = scmp.eq.s32.totalorder %s3743_s22, 0 }
  0x90   : > { %3646 = dma.done.wait (%p5486_p11), [#allocation6], 16384   ;;  %p5487_p0 = pmov %p5486_p11 }
  0x92   : > { %3648 = vsyncadd (%p5487_p0), [#allocation6], 4294950912  ;;  %p5488_p9 = pmov %p5487_p0 }
  0x93   : > { %p5489_p12 = pmov %p5487_p0 }
  0x94   : > { %3650 = dma.done.wait (%p5488_p9), [#allocation9], 640  }
  0x95   : > { %3652 = vsyncadd (%p5489_p12), [#allocation9], 4294966656  ;;  %v309_v0 = vld [vmem:[#allocation7 + $0x8] sm:$0xff]  ;;  %v311_v2 = vld [vmem:[#allocation7 + $0x18] sm:$0xff]  ;;  %s3679_s24 = smov 90   ;;  %s3680_s30 = smov 126  }
  0x96   : > { %v313_v1 = vld [vmem:[#allocation7 + $0x28] sm:$0xff]  ;;  %v315_v4 = vld [vmem:[#allocation7 + $0x38] sm:$0xff]  ;;  %v308_v5 = vld [vmem:[#allocation7] sm:$0xff]  ;;  %s3681_s13 = smov 110   ;;  %s3682_s23 = smov 92   ;;  %vm838_vm0 = vcmask 1039360  }
  0x97   : > { %v2382_v3 = vpack.c.bf16 %v313_v1, %v309_v0  ;;  %v312_v6 = vld [vmem:[#allocation7 + $0x20] sm:$0xff]  ;;  %v2446_v7 = vpack.c.bf16 %v315_v4, %v311_v2  ;;  %v310_v9 = vld [vmem:[#allocation7 + $0x10] sm:$0xff]  ;;  %v317_v11 = vld [vmem:[#allocation7 + $0x48] sm:$0xff]  ;;  %s3683_s29 = smov 109   ;;  %s3684_s28 = smov 91   ;;  %vm951_vm1 = vcmask 1031168  }
  0x98   : > { %v2384_v8 = vpack.c.bf16 %v312_v6, %v308_v5  ;;  %v314_v10 = vld [vmem:[#allocation7 + $0x30] sm:$0xff]  ;;  %v321_v13 = vld [vmem:[#allocation7 + $0x68] sm:$0xff]  ;;  %v319_v14 = vld [vmem:[#allocation7 + $0x58] sm:$0xff]  ;;  %s3685_s12 = smov 127   ;;  %s3686_s27 = smov 108   ;;  %vm1629_vm2 = vcmask 736256  }
  0x99   : > { %2383 = vmatprep.subr.bf16.mxu0 %v2382_v3  ;;  %v2448_v12 = vpack.c.bf16 %v314_v10, %v310_v9  ;;  %v323_v15 = vld [vmem:[#allocation7 + $0x78] sm:$0xff]  ;;  %2447 = vmatprep.subr.bf16.mxu1 %v2446_v7  ;;  %v2386_v16 = vpack.c.bf16 %v321_v13, %v317_v11  ;;  %v316_v18 = vld [vmem:[#allocation7 + $0x40] sm:$0xff]  ;;  %v318_v20 = vld [vmem:[#allocation7 + $0x50] sm:$0xff]  ;;  %vm1064_vm3 = vcmask 900096   ;;  %vm1689_vm4 = vcmask 523264   ;;  %s2736_s8 = smul.u32 24, %s3926_s0 }
  0x9a   : > { %2385 = vmatpush1.bf16.msra.mxu0 %v2384_v8  ;;  %v2450_v17 = vpack.c.bf16 %v323_v15, %v319_v14  ;;  %v320_v19 = vld [vmem:[#allocation7 + $0x60] sm:$0xff]  ;;  %v322_v22 = vld [vmem:[#allocation7 + $0x70] sm:$0xff]  ;;  %v325_v23 = vld [vmem:[#allocation7 + $0x88] sm:$0xff]  ;;  %vm1177_vm5 = vcmask 891904   ;;  %vm1290_vm6 = vcmask 883712   ;;  %vm1403_vm7 = vcmask 752640  }
  0x9b   : > { %2449 = vmatpush1.bf16.msra.mxu1 %v2448_v12  ;;  %v2388_v21 = vpack.c.bf16 %v320_v19, %v316_v18  ;;  %v329_v24 = vld [vmem:[#allocation7 + $0xa8] sm:$0xff]  ;;  %2387 = vmatprep.subr.bf16.mxu0 %v2386_v16  ;;  %v2452_v25 = vpack.c.bf16 %v322_v22, %v318_v20  ;;  %v327_v27 = vld [vmem:[#allocation7 + $0x98] sm:$0xff]  ;;  %v324_v29 = vld [vmem:[#allocation7 + $0x80] sm:$0xff]  ;;  %vm1516_vm8 = vcmask 744448   ;;  %vm3690_vm9 = vmmov 0   ;;  %s305_s26 = scalar_lea.vmem [#allocation10], %s2736_s8 }
  0x9c   : > { %2451 = vmatprep.subr.bf16.mxu1 %v2450_v17  ;;  %v2390_v26 = vpack.c.bf16 %v329_v24, %v325_v23  ;;  %v331_v28 = vld [vmem:[#allocation7 + $0xb8] sm:$0xff]  ;;  %v328_v31 = vld [vmem:[#allocation7 + $0xa0] sm:$0xff]  ;;  %v326_v32 = vld [vmem:[#allocation7 + $0x90] sm:$0xff]  ;;  %s2149_s11 = sshll.u32 %s305_s26, 4  ;;  %p5576_p13 = scmp.ne.s32.totalorder %s5481_s16, 0  ;;  %s5381_s11 = int_to_ptr.vmem [resolvable:$true] %s2149_s11 }
  0x9d   : > { %v2454_v30 = vpack.c.bf16 %v331_v28, %v327_v27  ;;  %v330_v33 = vld [vmem:[#allocation7 + $0xb0] sm:$0xff]  ;;  %v2392_v34 = vpack.c.bf16 %v328_v31, %v324_v29  ;;  %v333_v35 = vld [vmem:[#allocation7 + $0xc8] sm:$0xff]  ;;  %v335_v37 = vld [vmem:[#allocation7 + $0xd8] sm:$0xff] }
  0x9e   : > { %2389 = vmatpush1.bf16.msra.mxu0 %v2388_v21  ;;  %v337_v36 = vld [vmem:[#allocation7 + $0xe8] sm:$0xff]  ;;  %v2456_v38 = vpack.c.bf16 %v330_v33, %v326_v32  ;;  %v339_v40 = vld [vmem:[#allocation7 + $0xf8] sm:$0xff]  ;;  %v332_v41 = vld [vmem:[#allocation7 + $0xc0] sm:$0xff] }
  0x9f   : > { %2453 = vmatpush1.bf16.msra.mxu1 %v2452_v25  ;;  %2391 = vmatprep.subr.bf16.mxu0 %v2390_v26  ;;  %v2394_v39 = vpack.c.bf16 %v337_v36, %v333_v35  ;;  %v336_v42 = vld [vmem:[#allocation7 + $0xe0] sm:$0xff]  ;;  %v2458_v43 = vpack.c.bf16 %v339_v40, %v335_v37  ;;  %v334_v44 = vld [vmem:[#allocation7 + $0xd0] sm:$0xff]  ;;  %v341_v46 = vld [vmem:[#allocation7 + $0x108] sm:$0xff] }
  0xa0   : > { %2455 = vmatprep.subr.bf16.mxu1 %v2454_v30  ;;  %v338_v45 = vld [vmem:[#allocation7 + $0xf0] sm:$0xff]  ;;  %v345_v47 = vld [vmem:[#allocation7 + $0x128] sm:$0xff]  ;;  %v343_v48 = vld [vmem:[#allocation7 + $0x118] sm:$0xff]  ;;  %v2396_v50 = vpack.c.bf16 %v336_v42, %v332_v41 }
  0xa1   : > { %v347_v49 = vld [vmem:[#allocation7 + $0x138] sm:$0xff]  ;;  %v2460_v51 = vpack.c.bf16 %v338_v45, %v334_v44  ;;  %v2398_v52 = vpack.c.bf16 %v345_v47, %v341_v46  ;;  %v340_v53 = vld [vmem:[#allocation7 + $0x100] sm:$0xff]  ;;  %v342_v55 = vld [vmem:[#allocation7 + $0x110] sm:$0xff] }
  0xa2   : > { %2393 = vmatpush1.bf16.msra.mxu0 %v2392_v34  ;;  %v344_v54 = vld [vmem:[#allocation7 + $0x120] sm:$0xff]  ;;  %v2462_v56 = vpack.c.bf16 %v347_v49, %v343_v48  ;;  %v346_v57 = vld [vmem:[#allocation7 + $0x130] sm:$0xff]  ;;  %v349_v58 = vld [vmem:[#allocation7 + $0x148] sm:$0xff] }
  0xa3   : > { %2457 = vmatpush1.bf16.msra.mxu1 %v2456_v38  ;;  %2395 = vmatprep.subr.bf16.mxu0 %v2394_v39  ;;  %v353_v59 = vld [vmem:[#allocation7 + $0x168] sm:$0xff]  ;;  %v351_v60 = vld [vmem:[#allocation7 + $0x158] sm:$0xff]  ;;  %v2400_v62 = vpack.c.bf16 %v344_v54, %v340_v53  ;;  %v2464_v63 = vpack.c.bf16 %v346_v57, %v342_v55  ;;  %v348_v1 = vld [vmem:[#allocation7 + $0x140] sm:$0xff] }
  0xa4   : > { %2459 = vmatprep.subr.bf16.mxu1 %v2458_v43  ;;  %v355_v61 = vld [vmem:[#allocation7 + $0x178] sm:$0xff]  ;;  %v2402_v0 = vpack.c.bf16 %v353_v59, %v349_v58  ;;  %v352_v2 = vld [vmem:[#allocation7 + $0x160] sm:$0xff]  ;;  %v350_v3 = vld [vmem:[#allocation7 + $0x150] sm:$0xff] }
  0xa5   : > { %v2466_v4 = vpack.c.bf16 %v355_v61, %v351_v60  ;;  %v354_v5 = vld [vmem:[#allocation7 + $0x170] sm:$0xff]  ;;  %v357_v6 = vld [vmem:[#allocation7 + $0x188] sm:$0xff]  ;;  %v359_v8 = vld [vmem:[#allocation7 + $0x198] sm:$0xff]  ;;  %v2404_v10 = vpack.c.bf16 %v352_v2, %v348_v1 }
  0xa6   : > { %2397 = vmatpush1.bf16.msra.mxu0 %v2396_v50  ;;  %v361_v7 = vld [vmem:[#allocation7 + $0x1a8] sm:$0xff]  ;;  %v363_v9 = vld [vmem:[#allocation7 + $0x1b8] sm:$0xff]  ;;  %v2468_v11 = vpack.c.bf16 %v354_v5, %v350_v3  ;;  %v356_v13 = vld [vmem:[#allocation7 + $0x180] sm:$0xff] }
  0xa7   : > { %2461 = vmatpush1.bf16.msra.mxu1 %v2460_v51  ;;  %2399 = vmatprep.subr.bf16.mxu0 %v2398_v52  ;;  %v2406_v12 = vpack.c.bf16 %v361_v7, %v357_v6  ;;  %v360_v14 = vld [vmem:[#allocation7 + $0x1a0] sm:$0xff]  ;;  %v358_v15 = vld [vmem:[#allocation7 + $0x190] sm:$0xff]  ;;  %v2470_v16 = vpack.c.bf16 %v363_v9, %v359_v8  ;;  %v365_v18 = vld [vmem:[#allocation7 + $0x1c8] sm:$0xff] }
  0xa8   : > { %2463 = vmatprep.subr.bf16.mxu1 %v2462_v56  ;;  %v362_v17 = vld [vmem:[#allocation7 + $0x1b0] sm:$0xff]  ;;  %v369_v19 = vld [vmem:[#allocation7 + $0x1e8] sm:$0xff]  ;;  %v367_v20 = vld [vmem:[#allocation7 + $0x1d8] sm:$0xff]  ;;  %v2408_v22 = vpack.c.bf16 %v360_v14, %v356_v13 }
  0xa9   : > { %v371_v21 = vld [vmem:[#allocation7 + $0x1f8] sm:$0xff]  ;;  %v2472_v23 = vpack.c.bf16 %v362_v17, %v358_v15  ;;  %v2410_v24 = vpack.c.bf16 %v369_v19, %v365_v18  ;;  %v364_v25 = vld [vmem:[#allocation7 + $0x1c0] sm:$0xff]  ;;  %v366_v27 = vld [vmem:[#allocation7 + $0x1d0] sm:$0xff] }
  0xaa   : > { %2401 = vmatpush1.bf16.msra.mxu0 %v2400_v62  ;;  %v368_v26 = vld [vmem:[#allocation7 + $0x1e0] sm:$0xff]  ;;  %v2474_v28 = vpack.c.bf16 %v371_v21, %v367_v20  ;;  %v370_v29 = vld [vmem:[#allocation7 + $0x1f0] sm:$0xff]  ;;  %v373_v30 = vld [vmem:[#allocation7 + $0x208] sm:$0xff] }
  0xab   : > { %2465 = vmatpush1.bf16.msra.mxu1 %v2464_v63  ;;  %2403 = vmatprep.subr.bf16.mxu0 %v2402_v0  ;;  %v377_v31 = vld [vmem:[#allocation7 + $0x228] sm:$0xff]  ;;  %v375_v32 = vld [vmem:[#allocation7 + $0x218] sm:$0xff]  ;;  %v2412_v34 = vpack.c.bf16 %v368_v26, %v364_v25  ;;  %v2476_v35 = vpack.c.bf16 %v370_v29, %v366_v27  ;;  %v372_v37 = vld [vmem:[#allocation7 + $0x200] sm:$0xff] }
  0xac   : > { %2467 = vmatprep.subr.bf16.mxu1 %v2466_v4  ;;  %v379_v33 = vld [vmem:[#allocation7 + $0x238] sm:$0xff]  ;;  %v2414_v36 = vpack.c.bf16 %v377_v31, %v373_v30  ;;  %v376_v38 = vld [vmem:[#allocation7 + $0x220] sm:$0xff]  ;;  %v374_v39 = vld [vmem:[#allocation7 + $0x210] sm:$0xff] }
  0xad   : > { %v2478_v40 = vpack.c.bf16 %v379_v33, %v375_v32  ;;  %v378_v41 = vld [vmem:[#allocation7 + $0x230] sm:$0xff]  ;;  %v381_v42 = vld [vmem:[#allocation7 + $0x248] sm:$0xff]  ;;  %v383_v44 = vld [vmem:[#allocation7 + $0x258] sm:$0xff]  ;;  %v2416_v46 = vpack.c.bf16 %v376_v38, %v372_v37 }
  0xae   : > { %2405 = vmatpush1.bf16.msra.mxu0 %v2404_v10  ;;  %v385_v43 = vld [vmem:[#allocation7 + $0x268] sm:$0xff]  ;;  %v387_v45 = vld [vmem:[#allocation7 + $0x278] sm:$0xff]  ;;  %v2480_v47 = vpack.c.bf16 %v378_v41, %v374_v39  ;;  %v380_v49 = vld [vmem:[#allocation7 + $0x240] sm:$0xff] }
  0xaf   : > { %2469 = vmatpush1.bf16.msra.mxu1 %v2468_v11  ;;  %2407 = vmatprep.subr.bf16.mxu0 %v2406_v12  ;;  %v2418_v48 = vpack.c.bf16 %v385_v43, %v381_v42  ;;  %v384_v50 = vld [vmem:[#allocation7 + $0x260] sm:$0xff]  ;;  %v382_v51 = vld [vmem:[#allocation7 + $0x250] sm:$0xff]  ;;  %v2482_v52 = vpack.c.bf16 %v387_v45, %v383_v44  ;;  %v389_v54 = vld [vmem:[#allocation7 + $0x288] sm:$0xff] }
  0xb0   : > { %2471 = vmatprep.subr.bf16.mxu1 %v2470_v16  ;;  %v386_v53 = vld [vmem:[#allocation7 + $0x270] sm:$0xff]  ;;  %v393_v55 = vld [vmem:[#allocation7 + $0x2a8] sm:$0xff]  ;;  %v391_v56 = vld [vmem:[#allocation7 + $0x298] sm:$0xff]  ;;  %v2420_v58 = vpack.c.bf16 %v384_v50, %v380_v49 }
  0xb1   : > { %v395_v57 = vld [vmem:[#allocation7 + $0x2b8] sm:$0xff]  ;;  %v2484_v59 = vpack.c.bf16 %v386_v53, %v382_v51  ;;  %v2422_v60 = vpack.c.bf16 %v393_v55, %v389_v54  ;;  %v388_v61 = vld [vmem:[#allocation7 + $0x280] sm:$0xff]  ;;  %v390_v63 = vld [vmem:[#allocation7 + $0x290] sm:$0xff] }
  0xb2   : > { %2409 = vmatpush1.bf16.msra.mxu0 %v2408_v22  ;;  %v392_v62 = vld [vmem:[#allocation7 + $0x2a0] sm:$0xff]  ;;  %v2486_v0 = vpack.c.bf16 %v395_v57, %v391_v56  ;;  %v394_v1 = vld [vmem:[#allocation7 + $0x2b0] sm:$0xff]  ;;  %v397_v2 = vld [vmem:[#allocation7 + $0x2c8] sm:$0xff] }
  0xb3   : > { %2473 = vmatpush1.bf16.msra.mxu1 %v2472_v23  ;;  %2411 = vmatprep.subr.bf16.mxu0 %v2410_v24  ;;  %v401_v3 = vld [vmem:[#allocation7 + $0x2e8] sm:$0xff]  ;;  %v399_v4 = vld [vmem:[#allocation7 + $0x2d8] sm:$0xff]  ;;  %v2424_v6 = vpack.c.bf16 %v392_v62, %v388_v61  ;;  %v396_v7 = vld [vmem:[#allocation7 + $0x2c0] sm:$0xff]  ;;  %v2488_v8 = vpack.c.bf16 %v394_v1, %v390_v63 }
  0xb4   : > { %2475 = vmatprep.subr.bf16.mxu1 %v2474_v28  ;;  %v403_v5 = vld [vmem:[#allocation7 + $0x2f8] sm:$0xff]  ;;  %v2426_v9 = vpack.c.bf16 %v401_v3, %v397_v2  ;;  %v400_v10 = vld [vmem:[#allocation7 + $0x2e0] sm:$0xff]  ;;  %v398_v11 = vld [vmem:[#allocation7 + $0x2d0] sm:$0xff]  ;;  %v582_v2 = vlaneseq }
  0xb5   : > { %v402_v12 = vld [vmem:[#allocation7 + $0x2f0] sm:$0xff]  ;;  %v2490_v13 = vpack.c.bf16 %v403_v5, %v399_v4  ;;  %v405_v14 = vld [vmem:[#allocation7 + $0x308] sm:$0xff]  ;;  %v407_v17 = vld [vmem:[#allocation7 + $0x318] sm:$0xff]  ;;  %v2428_v19 = vpack.c.bf16 %v400_v10, %v396_v7 }
  0xb6   : > { %2413 = vmatpush1.bf16.msra.mxu0 %v2412_v34  ;;  %v409_v15 = vld [vmem:[#allocation7 + $0x328] sm:$0xff]  ;;  %v411_v18 = vld [vmem:[#allocation7 + $0x338] sm:$0xff]  ;;  %v2492_v20 = vpack.c.bf16 %v402_v12, %v398_v11  ;;  %v404_v22 = vld [vmem:[#allocation7 + $0x300] sm:$0xff]  ;;  %v583_v3 = vshrl.u32 %v582_v2, 7 }
  0xb7   : > { %2477 = vmatpush1.bf16.msra.mxu1 %v2476_v35  ;;  %2415 = vmatprep.subr.bf16.mxu0 %v2414_v36  ;;  %v307_v16 = vld [vmem:[%s3930_s10 + $0x8] sm:$0xff]  ;;  %v2430_v21 = vpack.c.bf16 %v409_v15, %v405_v14  ;;  %v408_v23 = vld [vmem:[#allocation7 + $0x320] sm:$0xff]  ;;  %v406_v24 = vld [vmem:[#allocation7 + $0x310] sm:$0xff]  ;;  %v2494_v25 = vpack.c.bf16 %v411_v18, %v407_v17 }
  0xb8   : > { %2479 = vmatprep.subr.bf16.mxu1 %v2478_v40  ;;  %504 = vmatprep.mubr.f32.mxu0 %v307_v16  ;;  %v410_v26 = vld [vmem:[#allocation7 + $0x330] sm:$0xff]  ;;  %v413_v27 = vld [vmem:[#allocation7 + $0x348] sm:$0xff]  ;;  %v415_v29 = vld [vmem:[#allocation7 + $0x358] sm:$0xff]  ;;  %v2432_v31 = vpack.c.bf16 %v408_v23, %v404_v22  ;;  %v3954_v4 = vsub.s32 0, %v583_v3  ;;  %v3956_v5 = vsub.s32 1, %v583_v3  ;;  %v3960_v7 = vsub.s32 3, %v583_v3 }
  0xb9   : > { %575 = vmatprep.mubr.f32.mxu1 %v307_v16  ;;  %v417_v28 = vld [vmem:[#allocation7 + $0x368] sm:$0xff]  ;;  %v419_v30 = vld [vmem:[#allocation7 + $0x378] sm:$0xff]  ;;  %v2496_v32 = vpack.c.bf16 %v410_v26, %v406_v24  ;;  %v412_v34 = vld [vmem:[#allocation7 + $0x340] sm:$0xff]  ;;  %v3962_v10 = vsub.s32 4, %v583_v3  ;;  %v3964_v11 = vsub.s32 5, %v583_v3  ;;  %v3966_v14 = vsub.s32 6, %v583_v3 }
  0xba   : > { %2417 = vmatpush1.bf16.msra.mxu0 %v2416_v46  ;;  %v2434_v33 = vpack.c.bf16 %v417_v28, %v413_v27  ;;  %v416_v35 = vld [vmem:[#allocation7 + $0x360] sm:$0xff]  ;;  %v414_v36 = vld [vmem:[#allocation7 + $0x350] sm:$0xff]  ;;  %v2498_v37 = vpack.c.bf16 %v419_v30, %v415_v29  ;;  %v421_v39 = vld [vmem:[#allocation7 + $0x388] sm:$0xff]  ;;  %v3968_v15 = vsub.s32 7, %v583_v3 }
  0xbb   : > { %2481 = vmatpush1.bf16.msra.mxu1 %v2480_v47  ;;  %2419 = vmatprep.subr.bf16.mxu0 %v2418_v48  ;;  %v418_v38 = vld [vmem:[#allocation7 + $0x370] sm:$0xff]  ;;  %v425_v40 = vld [vmem:[#allocation7 + $0x3a8] sm:$0xff]  ;;  %v423_v41 = vld [vmem:[#allocation7 + $0x398] sm:$0xff]  ;;  %v2436_v43 = vpack.c.bf16 %v416_v35, %v412_v34 }
  0xbc   : > { %2483 = vmatprep.subr.bf16.mxu1 %v2482_v52  ;;  %v427_v42 = vld [vmem:[#allocation7 + $0x3b8] sm:$0xff]  ;;  %v2500_v44 = vpack.c.bf16 %v418_v38, %v414_v36  ;;  %v2438_v45 = vpack.c.bf16 %v425_v40, %v421_v39  ;;  %v420_v46 = vld [vmem:[#allocation7 + $0x380] sm:$0xff]  ;;  %v422_v48 = vld [vmem:[#allocation7 + $0x390] sm:$0xff] }
  0xbd   : > { %v424_v47 = vld [vmem:[#allocation7 + $0x3a0] sm:$0xff]  ;;  %v2502_v49 = vpack.c.bf16 %v427_v42, %v423_v41  ;;  %v426_v50 = vld [vmem:[#allocation7 + $0x3b0] sm:$0xff]  ;;  %v429_v51 = vld [vmem:[#allocation7 + $0x3c8] sm:$0xff] }
  0xbe   : > { %2421 = vmatpush1.bf16.msra.mxu0 %v2420_v58  ;;  %v433_v52 = vld [vmem:[#allocation7 + $0x3e8] sm:$0xff]  ;;  %v431_v53 = vld [vmem:[#allocation7 + $0x3d8] sm:$0xff]  ;;  %v2440_v55 = vpack.c.bf16 %v424_v47, %v420_v46  ;;  %v2504_v56 = vpack.c.bf16 %v426_v50, %v422_v48  ;;  %v428_v58 = vld [vmem:[#allocation7 + $0x3c0] sm:$0xff] }
  0xbf   : > { %2485 = vmatpush1.bf16.msra.mxu1 %v2484_v59  ;;  %2423 = vmatprep.subr.bf16.mxu0 %v2422_v60  ;;  %v435_v54 = vld [vmem:[#allocation7 + $0x3f8] sm:$0xff]  ;;  %v2442_v57 = vpack.c.bf16 %v433_v52, %v429_v51  ;;  %v432_v59 = vld [vmem:[#allocation7 + $0x3e0] sm:$0xff]  ;;  %v430_v61 = vld [vmem:[#allocation7 + $0x3d0] sm:$0xff] }
  0xc0   : > { %2487 = vmatprep.subr.bf16.mxu1 %v2486_v0  ;;  %v2506_v60 = vpack.c.bf16 %v435_v54, %v431_v53  ;;  %v434_v62 = vld [vmem:[#allocation7 + $0x3f0] sm:$0xff]  ;;  %v2444_v63 = vpack.c.bf16 %v432_v59, %v428_v58  ;;  %v436_v18 = vld [vmem:[%s3938_s6] sm:$0xff]  ;;  %v437_v46 = vld [vmem:[%s3938_s6 + $0x8] sm:$0xff] }
  0xc1   : > { %v2508_v0 = vpack.c.bf16 %v434_v62, %v430_v61  ;;  %v306_v1 = vld [vmem:[%s3930_s10] sm:$0xff]  ;;  %s2737_s10 = smul.u32 384, %s3743_s22  ;;  %s3593_s22 = scalar_lea.vmem %s5381_s11, 384 }
  0xc2   : > { %2425 = vmatpush1.bf16.msra.mxu0 %v2424_v6  ;;  %v3958_v6 = vsub.s32 2, %v583_v3  ;;  %p3594_p2 = scmp.ne.s32.totalorder %s5381_s11, %s3593_s22 }
  0xc3   : > { %2489 = vmatpush1.bf16.msra.mxu1 %v2488_v8  ;;  %2427 = vmatprep.subr.bf16.mxu0 %v2426_v9 }
  0xc4   : > { %2491 = vmatprep.subr.bf16.mxu1 %v2490_v13  ;;  %p3595_p6 = pnand %p3594_p2, %p5576_p13 }
  0xc6   : > { %2429 = vmatpush1.bf16.msra.mxu0 %v2428_v19  ;;  %p3596_p10 = pneg %p3595_p6 }
  0xc7   : > { %2493 = vmatpush1.bf16.msra.mxu1 %v2492_v20  ;;  %2431 = vmatprep.subr.bf16.mxu0 %v2430_v21 }
  0xc8   : > { %2495 = vmatprep.subr.bf16.mxu1 %v2494_v25 }
  0xca   : > { %2433 = vmatpush1.bf16.msra.mxu0 %v2432_v31 }
  0xcb   : > { %2497 = vmatpush1.bf16.msra.mxu1 %v2496_v32  ;;  %2435 = vmatprep.subr.bf16.mxu0 %v2434_v33  ;;  %v438_v32 = vld [vmem:[%s3938_s6 + $0x10] sm:$0xff] }
  0xcc   : > { %2499 = vmatprep.subr.bf16.mxu1 %v2498_v37 }
  0xce   : > { %2437 = vmatpush1.bf16.msra.mxu0 %v2436_v43 }
  0xcf   : > { %2501 = vmatpush1.bf16.msra.mxu1 %v2500_v44  ;;  %2439 = vmatprep.subr.bf16.mxu0 %v2438_v45 }
  0xd0   : > { %2503 = vmatprep.subr.bf16.mxu1 %v2502_v49 }
  0xd2   : > { %2441 = vmatpush1.bf16.msra.mxu0 %v2440_v55 }
  0xd3   : > { %2505 = vmatpush1.bf16.msra.mxu1 %v2504_v56  ;;  %2443 = vmatprep.subr.bf16.mxu0 %v2442_v57 }
  0xd4   : > { %2507 = vmatprep.subr.bf16.mxu1 %v2506_v60 }
  0xd6   : > { %2445 = vmatpush1.bf16.msra.mxu0 %v2444_v63 }
  0xd7   : > { %2509 = vmatpush1.bf16.msra.mxu1 %v2508_v0 }
  0xd9   : > { %505 = vmatmul.mubr.f32.vlgmr.msra.gmra.mrb[0].mxu0 %v306_v1 }
  0xda   : > { %576 = vmatmul.mubr.f32.vlgmr.msra.gmra.mrb[0].mxu1 %v306_v1 }
 0x1ac   : > { %v506_v8 = vpop.f32.mrb[0].mxu0 }
 0x1ad   : > { %v507_v9 = vadd.f32 1.0, %v506_v8  ;;  %v577_v12 = vpop.f32.mrb[0].mxu1  ;;  %v508_v13 = vpop.f32.mrb[1].mxu0 }
 0x1ae   : > { %v578_v16 = vadd.f32 1.0, %v577_v12  ;;  %v579_v17 = vpop.f32.mrb[1].mxu1  ;;  %v509_v28 = vadd.f32 1.0, %v508_v13  ;;  %v439_v13 = vld [vmem:[%s3938_s6 + $0x18] sm:$0xff] }
 0x1af   : > { %v585_v19 = vrot.slane %v507_v9, %v3954_v4  ;;  %v605_v20 = vrot.slane %v507_v9, %v3956_v5  ;;  %v625_v21 = vrot.slane %v507_v9, %v3958_v6  ;;  %v645_v22 = vrot.slane %v507_v9, %v3960_v7 }
 0x1b0   : > { %v665_v23 = vrot.slane %v507_v9, %v3962_v10  ;;  %v685_v24 = vrot.slane %v507_v9, %v3964_v11  ;;  %v705_v26 = vrot.slane %v507_v9, %v3966_v14  ;;  %v725_v27 = vrot.slane %v507_v9, %v3968_v15 }
 0x1b1   : > { %v3977_v25 = vmul.f32 %v585_v19, %v436_v18  ;;  %v3981_v29 = vmul.f32 %v605_v20, %v436_v18  ;;  %v3983_v30 = vmul.f32 %v625_v21, %v436_v18  ;;  %v3985_v31 = vmul.f32 %v645_v22, %v436_v18 }
 0x1b2   : > { %v593_v33 = vrot.slane %v578_v16, %v3954_v4  ;;  %v613_v34 = vrot.slane %v578_v16, %v3956_v5  ;;  %v633_v35 = vrot.slane %v578_v16, %v3958_v6  ;;  %v653_v36 = vrot.slane %v578_v16, %v3960_v7 }
 0x1b3   : > { %v733_v37 = vrot.slane %v578_v16, %v3968_v15  ;;  %v3993_v38 = vmul.f32 %v665_v23, %v436_v18  ;;  %v3995_v39 = vmul.f32 %v685_v24, %v436_v18  ;;  %v673_v40 = vrot.slane %v578_v16, %v3962_v10 }
 0x1b4   : > { %v693_v41 = vrot.slane %v578_v16, %v3964_v11  ;;  %v3999_v42 = vmul.f32 %v705_v26, %v436_v18  ;;  %v4001_v43 = vmul.f32 %v725_v27, %v436_v18  ;;  %v4003_v44 = vmul.f32 %v593_v33, %v438_v32 }
 0x1b5   : > { %v713_v45 = vrot.slane %v578_v16, %v3966_v14  ;;  %v589_v47 = vrot.slane %v509_v28, %v3954_v4  ;;  %v609_v48 = vrot.slane %v509_v28, %v3956_v5  ;;  %v629_v49 = vrot.slane %v509_v28, %v3958_v6 }
 0x1b6   : > { %v649_v50 = vrot.slane %v509_v28, %v3960_v7  ;;  %v4011_v51 = vmul.f32 %v613_v34, %v438_v32  ;;  %v4013_v52 = vmul.f32 %v633_v35, %v438_v32  ;;  %v4015_v53 = vmul.f32 %v653_v36, %v438_v32 }
 0x1b7   : > { %v4017_v54 = vmul.f32 %v733_v37, %v438_v32  ;;  %v4019_v55 = vmul.f32 %v673_v40, %v438_v32  ;;  %v4021_v56 = vmul.f32 %v693_v41, %v438_v32  ;;  %v4023_v57 = vmul.f32 %v589_v47, %v437_v46 }
 0x1b8   : > { %v4025_v58 = vmul.f32 %v609_v48, %v437_v46  ;;  %v4027_v59 = vmul.f32 %v629_v49, %v437_v46  ;;  %v4029_v60 = vmul.f32 %v649_v50, %v437_v46  ;;  %v669_v61 = vrot.slane %v509_v28, %v3962_v10 }
 0x1b9   : > { %5490 = vst [vmem:[#allocation16_spill] sm:$0xff] %v4017_v54  ;;  %5491 = vst [vmem:[#allocation17_spill] sm:$0xff] %v4019_v55  ;;  %v689_v62 = vrot.slane %v509_v28, %v3964_v11  ;;  %v580_v63 = vadd.f32 1.0, %v579_v17  ;;  %v4035_v0 = vpack.i.bf16 %v3985_v31, %v3983_v30  ;;  %v4039_v1 = vpack.i.bf16 %v3981_v29, %v3977_v25 }
 0x1ba   : > { %5492 = vst [vmem:[#allocation18_spill] sm:$0xff] %v4021_v56  ;;  %v2510_v2 = vpack.c.bf16 %v4025_v58, %v4023_v57  ;;  %v4043_v3 = vmul.f32 %v713_v45, %v438_v32  ;;  %v709_v8 = vrot.slane %v509_v28, %v3966_v14  ;;  %v729_v9 = vrot.slane %v509_v28, %v3968_v15 }
 0x1bb   : > { %v2834_v12 = vpack.i.bf16 %v4001_v43, %v4017_v54  ;;  %v597_v16 = vrot.slane %v580_v63, %v3954_v4  ;;  %v617_v17 = vrot.slane %v580_v63, %v3956_v5  ;;  %v637_v18 = vrot.slane %v580_v63, %v3958_v6  ;;  %2830 = vrot.lane.b32.xlu0 %v4035_v0, %s3679_s24 }
 0x1bc   : > { %5493 = vst [vmem:[#allocation19_spill] sm:$0xff] %v4043_v3  ;;  %v657_v19 = vrot.slane %v580_v63, %v3960_v7  ;;  %v677_v20 = vrot.slane %v580_v63, %v3962_v10  ;;  %v697_v21 = vrot.slane %v580_v63, %v3964_v11  ;;  %v717_v22 = vrot.slane %v580_v63, %v3966_v14 }
 0x1bd   : > { %2825 = vrot.lane.b32.xlu1 %v4039_v1, %s3679_s24  ;;  %v2512_v4 = vpack.c.bf16 %v3981_v29, %v3977_v25  ;;  %v4063_v5 = vmul.f32 %v669_v61, %v437_v46  ;;  %v4065_v6 = vmul.f32 %v689_v62, %v437_v46  ;;  %v737_v7 = vrot.slane %v580_v63, %v3968_v15 }
 0x1be   : > { %2511 = vmatprep.subr.bf16.mxu0 %v2510_v2  ;;  %v2514_v10 = vpack.c.bf16 %v4029_v60, %v4027_v59  ;;  %v4070_v23 = vmul.f32 %v709_v8, %v437_v46  ;;  %v4072_v11 = vmul.f32 %v729_v9, %v437_v46  ;;  %v601_v14 = vmul.f32 %v597_v16, %v439_v13 }
 0x1bf   : > { %2513 = vmatpush1.bf16.msra.mxu0 %v2512_v4  ;;  %v4076_v24 = vpack.i.bf16 %v3995_v39, %v3993_v38  ;;  %v621_v26 = vmul.f32 %v617_v17, %v439_v13  ;;  %v641_v27 = vmul.f32 %v637_v18, %v439_v13  ;;  %v661_v28 = vmul.f32 %v657_v19, %v439_v13 }
 0x1c0   : > { %2515 = vmatprep.subr.bf16.mxu0 %v2514_v10  ;;  %2835 = vrot.lane.b32.xlu0 %v2834_v12, %s3680_s30  ;;  %v681_v15 = vmul.f32 %v677_v20, %v439_v13  ;;  %v701_v32 = vmul.f32 %v697_v21, %v439_v13  ;;  %v721_v33 = vmul.f32 %v717_v22, %v439_v13 }
 0x1c1   : > { %2840 = vrot.lane.b32.xlu1 %v4076_v24, %s3679_s24  ;;  %v2516_v34 = vpack.c.bf16 %v3985_v31, %v3983_v30  ;;  %v741_v35 = vmul.f32 %v737_v7, %v439_v13  ;;  %v2518_v36 = vpack.c.bf16 %v4065_v6, %v4063_v5  ;;  %v4087_v37 = vpack.i.bf16 %v4001_v43, %v3999_v42 }
 0x1c2   : > { %v2520_v40 = vpack.c.bf16 %v3995_v39, %v3993_v38  ;;  %v2522_v41 = vpack.c.bf16 %v4072_v11, %v4070_v23  ;;  %v2524_v45 = vpack.c.bf16 %v4001_v43, %v3999_v42  ;;  %v4101_v46 = vpack.i.bf16 %v4025_v58, %v3981_v29 }
 0x1c3   : > { %2517 = vmatpush1.bf16.msra.mxu0 %v2516_v34  ;;  %v4104_v47 = vpack.i.bf16 %v621_v26, %v4011_v51  ;;  %v4107_v48 = vpack.i.bf16 %v641_v27, %v4013_v52  ;;  %v4110_v49 = vpack.i.bf16 %v661_v28, %v4015_v53  ;;  %v4113_v50 = vpack.i.bf16 %v681_v15, %v4019_v55 }
 0x1c4   : > { %2519 = vmatprep.subr.bf16.mxu0 %v2518_v36  ;;  %2845 = vrot.lane.b32.xlu0 %v4087_v37, %s3679_s24  ;;  %v4116_v61 = vpack.i.bf16 %v701_v32, %v4021_v56  ;;  %v4121_v29 = vpack.i.bf16 %v721_v33, %v4043_v3  ;;  %v4124_v62 = vpack.i.bf16 %v741_v35, %v4017_v54  ;;  %v5433_v34 = vmov 0.0  }
 0x1c5   : > { %2850 = vrot.lane.b32.xlu1 %v4039_v1, %s3681_s13  ;;  %v4130_v63 = vpack.i.bf16 %v4023_v57, %v3977_v25  ;;  %v4133_v2 = vpack.i.bf16 %v601_v14, %v4003_v44  ;;  %v4137_v8 = vpack.i.bf16 %v4027_v59, %v3983_v30  ;;  %v4141_v9 = vpack.i.bf16 %v4029_v60, %v3985_v31 }
 0x1c6   : > { %v4145_v12 = vpack.i.bf16 %v4063_v5, %v3993_v38  ;;  %v4149_v25 = vpack.i.bf16 %v4065_v6, %v3995_v39  ;;  %v4155_v30 = vpack.i.bf16 %v4070_v23, %v3999_v42  ;;  %v4159_v31 = vpack.i.bf16 %v4003_v44, %v4023_v57  ;;  %1899 = vmatprep.mubr.f32.mxu1 %v5433_v34 }
 0x1c7   : > { %2521 = vmatpush1.bf16.msra.mxu0 %v2520_v40  ;;  %v3014_v13 = vpack.i.bf16 %v4072_v11, %v4001_v43  ;;  %v4165_v38 = vpack.i.bf16 %v4015_v53, %v4029_v60  ;;  %v4171_v39 = vpack.i.bf16 %v4019_v55, %v4063_v5  ;;  %v3119_v42 = vpack.i.bf16 %v4072_v11, %v4043_v3 }
 0x1c8   : > { %2523 = vmatprep.subr.bf16.mxu0 %v2522_v41  ;;  %2855 = vrot.lane.b32.xlu0 %v4035_v0, %s3681_s13  ;;  %v4177_v16 = vpack.i.bf16 %v4017_v54, %v4072_v11  ;;  %v4181_v43 = vpack.i.bf16 %v4011_v51, %v4025_v58  ;;  %v4185_v17 = vpack.i.bf16 %v741_v35, %v721_v33 }
 0x1c9   : > { %2860 = vrot.lane.b32.xlu1 %v4076_v24, %s3681_s13  ;;  %v4191_v18 = vpack.i.bf16 %v4013_v52, %v4027_v59  ;;  %v4195_v19 = vpack.i.bf16 %v4021_v56, %v4065_v6  ;;  %v4197_v20 = vpack.i.bf16 %v621_v26, %v601_v14  ;;  %v4201_v21 = vpack.i.bf16 %v4043_v3, %v4070_v23 }
 0x1ca   : > { %v4203_v22 = vpack.i.bf16 %v661_v28, %v641_v27  ;;  %v4207_v4 = vpack.i.bf16 %v701_v32, %v681_v15  ;;  %v4217_v7 = vpack.i.bf16 %v4025_v58, %v4023_v57  ;;  %v4223_v10 = vpack.i.bf16 %v4029_v60, %v4027_v59 }
 0x1cb   : > { %2525 = vmatpush1.bf16.msra.mxu0 %v2524_v45  ;;  %v4227_v14 = vpack.i.bf16 %v4065_v6, %v4063_v5  ;;  %v4233_v26 = vpack.i.bf16 %v4072_v11, %v4070_v23 }
 0x1cc   : > { %2865 = vrot.lane.b32.xlu0 %v4087_v37, %s3681_s13 }
 0x1cd   : > { %2910 = vrot.lane.b32.xlu1 %v4039_v1, %s3682_s23 }
 0x1d0   : > { %2870 = vrot.lane.b32.xlu0 %v4039_v1, %s3683_s29 }
 0x1d1   : > { %2920 = vrot.lane.b32.xlu1 %v4076_v24, %s3682_s23 }
 0x1d4   : > { %2875 = vrot.lane.b32.xlu0 %v4035_v0, %s3683_s29 }
 0x1d5   : > { %2930 = vrot.lane.b32.xlu1 %v4039_v1, %s3684_s28 }
 0x1d8   : > { %2880 = vrot.lane.b32.xlu0 %v4076_v24, %s3683_s29 }
 0x1d9   : > { %2940 = vrot.lane.b32.xlu1 %v4076_v24, %s3684_s28 }
 0x1dc   : > { %2885 = vrot.lane.b32.xlu0 %v4087_v37, %s3683_s29 }
 0x1dd   : > { %2955 = vrot.lane.b32.xlu1 %v4101_v46, %s3685_s12 }
 0x1e0   : > { %2890 = vrot.lane.b32.xlu0 %v4039_v1, %s3686_s27 }
 0x1e1   : > { %2960 = vrot.lane.b32.xlu1 %v4104_v47, %s3685_s12 }
 0x1e4   : > { %2895 = vrot.lane.b32.xlu0 %v4035_v0, %s3686_s27 }
 0x1e5   : > { %2970 = vrot.lane.b32.xlu1 %v4107_v48, %s3685_s12 }
 0x1e8   : > { %2900 = vrot.lane.b32.xlu0 %v4076_v24, %s3686_s27 }
 0x1e9   : > { %2980 = vrot.lane.b32.xlu1 %v4110_v49, %s3685_s12 }
 0x1ec   : > { %2905 = vrot.lane.b32.xlu0 %v4087_v37, %s3686_s27 }
 0x1ed   : > { %2990 = vrot.lane.b32.xlu1 %v4113_v50, %s3685_s12 }
 0x1f0   : > { %2915 = vrot.lane.b32.xlu0 %v4035_v0, %s3682_s23 }
 0x1f1   : > { %3000 = vrot.lane.b32.xlu1 %v4116_v61, %s3685_s12 }
 0x1f4   : > { %2925 = vrot.lane.b32.xlu0 %v4087_v37, %s3682_s23 }
 0x1f5   : > { %3010 = vrot.lane.b32.xlu1 %v4121_v29, %s3685_s12 }
 0x1f8   : > { %2935 = vrot.lane.b32.xlu0 %v4035_v0, %s3684_s28 }
 0x1f9   : > { %3020 = vrot.lane.b32.xlu1 %v4124_v62, %s3685_s12 }
 0x1fc   : > { %2945 = vrot.lane.b32.xlu0 %v4130_v63, %s3685_s12 }
 0x1fd   : > { %3030 = vrot.lane.b32.xlu1 %v4133_v2, %s3680_s30 }
 0x200   : > { %2950 = vrot.lane.b32.xlu0 %v4133_v2, %s3685_s12 }
 0x201   : > { %3040 = vrot.lane.b32.xlu1 %v4104_v47, %s3680_s30 }
 0x204   : > { %2965 = vrot.lane.b32.xlu0 %v4137_v8, %s3685_s12 }
 0x205   : > { %3050 = vrot.lane.b32.xlu1 %v4107_v48, %s3680_s30 }
 0x208   : > { %2975 = vrot.lane.b32.xlu0 %v4141_v9, %s3685_s12 }
 0x209   : > { %3060 = vrot.lane.b32.xlu1 %v4110_v49, %s3680_s30 }
 0x20c   : > { %2985 = vrot.lane.b32.xlu0 %v4145_v12, %s3685_s12 }
 0x20d   : > { %3070 = vrot.lane.b32.xlu1 %v4113_v50, %s3680_s30 }
 0x210   : > { %2995 = vrot.lane.b32.xlu0 %v4149_v25, %s3685_s12 }
 0x211   : > { %3080 = vrot.lane.b32.xlu1 %v4116_v61, %s3680_s30 }
 0x214   : > { %3005 = vrot.lane.b32.xlu0 %v4155_v30, %s3685_s12 }
 0x215   : > { %3090 = vrot.lane.b32.xlu1 %v4159_v31, %s3679_s24 }
 0x218   : > { %3015 = vrot.lane.b32.xlu0 %v3014_v13, %s3685_s12 }
 0x219   : > { %3105 = vrot.lane.b32.xlu1 %v4165_v38, %s3679_s24 }
 0x21c   : > { %3025 = vrot.lane.b32.xlu0 %v4130_v63, %s3680_s30 }
 0x21d   : > { %3110 = vrot.lane.b32.xlu1 %v4171_v39, %s3679_s24 }
 0x220   : > { %3035 = vrot.lane.b32.xlu0 %v4101_v46, %s3680_s30 }
 0x221   : > { %3120 = vrot.lane.b32.xlu1 %v3119_v42, %s3680_s30 }
 0x224   : > { %3045 = vrot.lane.b32.xlu0 %v4137_v8, %s3680_s30  ;;  %v4396_v8 = vld [vmem:[#allocation8 + $0x8] sm:$0xff] }
 0x225   : > { %3130 = vrot.lane.b32.xlu1 %v4177_v16, %s3679_s24  ;;  %1757 = vmatprep.mubr.f32.mxu0 %v4396_v8 }
 0x228   : > { %3055 = vrot.lane.b32.xlu0 %v4141_v9, %s3680_s30 }
 0x229   : > { %3140 = vrot.lane.b32.xlu1 %v4181_v43, %s3681_s13 }
 0x22c   : > { %3065 = vrot.lane.b32.xlu0 %v4145_v12, %s3680_s30 }
 0x22d   : > { %3150 = vrot.lane.b32.xlu1 %v4165_v38, %s3681_s13  ;;  %v4321_v0 = vpop.permute.xlu0 %2830 }
 0x22f   : > { %v4323_v1 = vpop.permute.xlu1 %2825 }
 0x230   : > { %3075 = vrot.lane.b32.xlu0 %v4149_v25, %s3680_s30 }
 0x231   : > { %3155 = vrot.lane.b32.xlu1 %v4171_v39, %s3681_s13 }
 0x232   : > { %v4329_v5 = vpop.permute.xlu0 %2835 }
 0x233   : > { %v4331_v6 = vpop.permute.xlu1 %2840 }
 0x234   : > { %3085 = vrot.lane.b32.xlu0 %v4155_v30, %s3680_s30 }
 0x235   : > { %3170 = vrot.lane.b32.xlu1 %v4177_v16, %s3681_s13 }
 0x236   : > { %v4337_v23 = vpop.permute.xlu0 %2845 }
 0x237   : > { %v4339_v11 = vpop.permute.xlu1 %2850 }
 0x238   : > { %3095 = vrot.lane.b32.xlu0 %v4181_v43, %s3679_s24 }
 0x239   : > { %3175 = vrot.lane.b32.xlu1 %v4185_v17, %s3680_s30  ;;  %s2135_s30 = scalar_lea.sflag [#allocation4], %s3926_s0 }
 0x23a   : > { %v4345_v24 = vpop.permute.xlu0 %2855 }
 0x23b   : > { %v4347_v27 = vpop.permute.xlu1 %2860 }
 0x23c   : > { %3100 = vrot.lane.b32.xlu0 %v4191_v18, %s3679_s24 }
 0x23d   : > { %3185 = vrot.lane.b32.xlu1 %v4181_v43, %s3683_s29 }
 0x23e   : > { %v4353_v28 = vpop.permute.xlu0 %2865 }
 0x23f   : > { %v4355_v15 = vpop.permute.xlu1 %2910 }
 0x240   : > { %5494 = vst [vmem:[#allocation20_spill] sm:$0xff] %v4355_v15  ;;  %3115 = vrot.lane.b32.xlu0 %v4195_v19, %s3679_s24 }
 0x241   : > { %3190 = vrot.lane.b32.xlu1 %v4197_v20, %s3681_s13 }
 0x242   : > { %v4361_v32 = vpop.permute.xlu0 %2870 }
 0x243   : > { %v4363_v33 = vpop.permute.xlu1 %2920 }
 0x244   : > { %5495 = vst [vmem:[#allocation21_spill] sm:$0xff] %v4363_v33  ;;  %3125 = vrot.lane.b32.xlu0 %v4201_v21, %s3679_s24 }
 0x245   : > { %3200 = vrot.lane.b32.xlu1 %v4165_v38, %s3683_s29 }
 0x246   : > { %v4370_v35 = vpop.permute.xlu0 %2875 }
 0x247   : > { %v4372_v36 = vpop.permute.xlu1 %2930 }
 0x248   : > { %5496 = vst [vmem:[#allocation22_spill] sm:$0xff] %v4372_v36  ;;  %3135 = vrot.lane.b32.xlu0 %v4159_v31, %s3681_s13 }
 0x249   : > { %3205 = vrot.lane.b32.xlu1 %v4203_v22, %s3681_s13 }
 0x24a   : > { %v4378_v40 = vpop.permute.xlu0 %2880 }
 0x24b   : > { %5497 = vst [vmem:[#allocation23_spill] sm:$0xff] %v4378_v40  ;;  %v4380_v41 = vpop.permute.xlu1 %2940 }
 0x24c   : > { %5498 = vst [vmem:[#allocation24_spill] sm:$0xff] %v4380_v41  ;;  %3145 = vrot.lane.b32.xlu0 %v4191_v18, %s3681_s13 }
 0x24d   : > { %3215 = vrot.lane.b32.xlu1 %v4195_v19, %s3683_s29 }
 0x24e   : > { %v4386_v45 = vpop.permute.xlu0 %2885 }
 0x24f   : > { %5499 = vst [vmem:[#allocation25_spill] sm:$0xff] %v4386_v45  ;;  %v4388_v46 = vpop.permute.xlu1 %2955 }
 0x250   : > { %3160 = vrot.lane.b32.xlu0 %v4195_v19, %s3681_s13  ;;  %v2958_v45 = vunpack.i.h.bf16 %v4388_v46 }
 0x251   : > { %3220 = vrot.lane.b32.xlu1 %v4207_v4, %s3681_s13 }
 0x252   : > { %v4394_v63 = vpop.permute.xlu0 %2890 }
 0x253   : > { %5500 = vst [vmem:[#allocation26_spill] sm:$0xff] %v4394_v63  ;;  %v4398_v9 = vpop.permute.xlu1 %2960 }
 0x254   : > { %v2963_v12 = vunpack.i.h.bf16 %v4398_v9  ;;  %v5434_v25 = vunpack.i.l.bf16 %v4398_v9  ;;  %3165 = vrot.lane.b32.xlu0 %v4201_v21, %s3681_s13 }
 0x255   : > { %3230 = vrot.lane.b32.xlu1 %v4177_v16, %s3683_s29 }
 0x256   : > { %v4410_v30 = vsel %vm838_vm0, %v5434_v25, %v2963_v12  ;;  %v4412_v13 = vpop.permute.xlu0 %2895 }
 0x257   : > { %5501 = vst [vmem:[#allocation27_spill] sm:$0xff] %v4410_v30  ;;  %5502 = vst [vmem:[#allocation28_spill] sm:$0xff] %v4412_v13  ;;  %v4414_v42 = vpop.permute.xlu1 %2970 }
 0x258   : > { %v2973_v34 = vunpack.i.h.bf16 %v4414_v42  ;;  %v5436_v60 = vunpack.i.l.bf16 %v4414_v42  ;;  %3180 = vrot.lane.b32.xlu0 %v4159_v31, %s3683_s29 }
 0x259   : > { %3235 = vrot.lane.b32.xlu1 %v4185_v17, %s3681_s13  ;;  %s3691_s13 = smov [#allocation10]  }
 0x25a   : > { %v4425_v59 = vsel %vm838_vm0, %v5436_v60, %v2973_v34  ;;  %v4427_v12 = vpop.permute.xlu0 %2900 }
 0x25b   : > { %5503 = vst [vmem:[#allocation29_spill] sm:$0xff] %v4425_v59  ;;  %5504 = vst [vmem:[#allocation30_spill] sm:$0xff] %v4427_v12  ;;  %v4429_v58 = vpop.permute.xlu1 %2980  ;;  %v2957_v59 = vunpack.i.l.bf16 %v4388_v46 }
 0x25c   : > { %v2983_v57 = vunpack.i.h.bf16 %v4429_v58  ;;  %v5440_v25 = vunpack.i.l.bf16 %v4429_v58  ;;  %3195 = vrot.lane.b32.xlu0 %v4191_v18, %s3683_s29 }
 0x25d   : > { %3245 = vrot.lane.b32.xlu1 %v4181_v43, %s3686_s27  ;;  %v842_v46 = vsel %vm838_vm0, %v2957_v59, %v2958_v45 }
 0x25e   : > { %v4440_v41 = vsel %vm838_vm0, %v5440_v25, %v2983_v57  ;;  %v4442_v34 = vpop.permute.xlu0 %2905 }
 0x25f   : > { %5505 = vst [vmem:[#allocation31_spill] sm:$0xff] %v4440_v41  ;;  %5506 = vst [vmem:[#allocation32_spill] sm:$0xff] %v4442_v34  ;;  %v4444_v60 = vpop.permute.xlu1 %2990 }
 0x260   : > { %v2993_v33 = vunpack.i.h.bf16 %v4444_v60  ;;  %v5443_v15 = vunpack.i.l.bf16 %v4444_v60  ;;  %3210 = vrot.lane.b32.xlu0 %v4171_v39, %s3683_s29 }
 0x261   : > { %3250 = vrot.lane.b32.xlu1 %v4133_v2, %s3682_s23 }
 0x262   : > { %v4457_v43 = vsel %vm838_vm0, %v5443_v15, %v2993_v33  ;;  %v4459_v57 = vpop.permute.xlu0 %2915 }
 0x263   : > { %5507 = vst [vmem:[#allocation33_spill] sm:$0xff] %v4457_v43  ;;  %5508 = vst [vmem:[#allocation34_spill] sm:$0xff] %v4459_v57  ;;  %v4461_v25 = vpop.permute.xlu1 %3000 }
 0x264   : > { %v3003_v36 = vunpack.i.h.bf16 %v4461_v25  ;;  %v5447_v34 = vunpack.i.l.bf16 %v4461_v25  ;;  %3225 = vrot.lane.b32.xlu0 %v4201_v21, %s3683_s29 }
 0x265   : > { %3260 = vrot.lane.b32.xlu1 %v4197_v20, %s3683_s29 }
 0x266   : > { %v4472_v12 = vsel %vm838_vm0, %v5447_v34, %v3003_v36  ;;  %v4474_v33 = vpop.permute.xlu0 %2925 }
 0x267   : > { %5509 = vst [vmem:[#allocation35_spill] sm:$0xff] %v4472_v12  ;;  %5510 = vst [vmem:[#allocation36_spill] sm:$0xff] %v4474_v33  ;;  %v4476_v15 = vpop.permute.xlu1 %3010 }
 0x268   : > { %v3013_v13 = vunpack.i.h.bf16 %v4476_v15  ;;  %v5450_v63 = vunpack.i.l.bf16 %v4476_v15  ;;  %3240 = vrot.lane.b32.xlu0 %v4159_v31, %s3686_s27 }
 0x269   : > { %3270 = vrot.lane.b32.xlu1 %v4165_v38, %s3686_s27 }
 0x26a   : > { %v4489_v36 = vsel %vm838_vm0, %v5450_v63, %v3013_v13  ;;  %v4491_v34 = vpop.permute.xlu0 %2935 }
 0x26b   : > { %5511 = vst [vmem:[#allocation37_spill] sm:$0xff] %v4489_v36  ;;  %5512 = vst [vmem:[#allocation38_spill] sm:$0xff] %v4491_v34  ;;  %v4493_v33 = vpop.permute.xlu1 %3020 }
 0x26c   : > { %v3023_v57 = vunpack.i.h.bf16 %v4493_v33  ;;  %v5455_v43 = vunpack.i.l.bf16 %v4493_v33  ;;  %3255 = vrot.lane.b32.xlu0 %v4104_v47, %s3682_s23 }
 0x26d   : > { %3275 = vrot.lane.b32.xlu1 %v4107_v48, %s3682_s23 }
 0x26e   : > { %v4504_v31 = vsel %vm838_vm0, %v5455_v43, %v3023_v57  ;;  %v2946_v38 = vpop.permute.xlu0 %2945  ;;  %v5515_v43 = vunpack.i.l.bf16 %v4398_v9 }
 0x26f   : > { %5513 = vst [vmem:[#allocation39_spill] sm:$0xff] %v4504_v31  ;;  %v4508_v63 = vpop.permute.xlu1 %3030  ;;  %v2948_v34 = vunpack.i.h.bf16 %v2946_v38  ;;  %v2947_v12 = vunpack.i.l.bf16 %v2946_v38 }
 0x270   : > { %3265 = vrot.lane.b32.xlu0 %v4191_v18, %s3686_s27  ;;  %v3033_v57 = vunpack.i.h.bf16 %v4508_v63  ;;  %v5516_v40 = vunpack.i.l.bf16 %v4508_v63 }
 0x271   : > { %3285 = vrot.lane.b32.xlu1 %v4203_v22, %s3683_s29  ;;  %v839_v38 = vsel %vm838_vm0, %v2947_v12, %v2948_v34  ;;  %v843_v12 = vsel %vm838_vm0, %v2958_v45, %v5515_v43 }
 0x272   : > { %v2951_v41 = vpop.permute.xlu0 %2950  ;;  %v4540_v59 = vsel %vm951_vm1, %v5516_v40, %v3033_v57 }
 0x273   : > { %v2953_v13 = vunpack.i.h.bf16 %v2951_v41  ;;  %v2952_v36 = vunpack.i.l.bf16 %v2951_v41  ;;  %v4518_v31 = vpop.permute.xlu1 %3040 }
 0x274   : > { %v3043_v18 = vunpack.i.h.bf16 %v4518_v31  ;;  %3280 = vrot.lane.b32.xlu0 %v4110_v49, %s3682_s23 }
 0x275   : > { %v4527_v54 = vsel %vm838_vm0, %v2952_v36, %v2953_v13  ;;  %3295 = vrot.lane.b32.xlu1 %v4195_v19, %s3686_s27  ;;  %v840_v41 = vsel %vm838_vm0, %v2948_v34, %v2952_v36  ;;  %v5517_v13 = vunpack.i.l.bf16 %v4518_v31  ;;  %v2528_v34 = vpack.c.bf16 %v842_v46, %v839_v38 }
 0x276   : > { %5514 = vst [vmem:[#allocation40_spill] sm:$0xff] %v4527_v54  ;;  %v2966_v55 = vpop.permute.xlu0 %2965  ;;  %v2526_v56 = vpack.c.bf16 %v843_v12, %v840_v41 }
 0x277   : > { %v4545_v19 = vsel %vm951_vm1, %v5517_v13, %v3043_v18  ;;  %v4547_v36 = vpop.permute.xlu1 %3050  ;;  %v2968_v9 = vunpack.i.h.bf16 %v2966_v55  ;;  %v2967_v43 = vunpack.i.l.bf16 %v2966_v55  ;;  %v5518_v13 = vunpack.i.l.bf16 %v4414_v42 }
 0x278   : > { %3290 = vrot.lane.b32.xlu0 %v4171_v39, %s3686_s27  ;;  %2527 = vmatprep.subr.bf16.mxu0 %v2526_v56  ;;  %v3053_v40 = vunpack.i.h.bf16 %v4547_v36  ;;  %v5520_v54 = vunpack.i.l.bf16 %v4547_v36 }
 0x279   : > { %3300 = vrot.lane.b32.xlu1 %v4113_v50, %s3682_s23  ;;  %2529 = vmatpush1.bf16.msra.mxu0 %v2528_v34  ;;  %v845_v55 = vsel %vm838_vm0, %v2967_v43, %v2968_v9  ;;  %v846_v34 = vsel %vm838_vm0, %v2968_v9, %v5518_v13 }
 0x27a   : > { %v2976_v38 = vpop.permute.xlu0 %2975  ;;  %v4576_v43 = vsel %vm951_vm1, %v5520_v54, %v3053_v40 }
 0x27b   : > { %v2978_v18 = vunpack.i.h.bf16 %v2976_v38  ;;  %v2977_v46 = vunpack.i.l.bf16 %v2976_v38  ;;  %v4557_v41 = vpop.permute.xlu1 %3060  ;;  %v5519_v38 = vunpack.i.l.bf16 %v4429_v58 }
 0x27c   : > { %v3063_v12 = vunpack.i.h.bf16 %v4557_v41  ;;  %3305 = vrot.lane.b32.xlu0 %v4116_v61, %s3682_s23 }
 0x27d   : > { %v848_v56 = vsel %vm838_vm0, %v2977_v46, %v2978_v18  ;;  %3310 = vrot.lane.b32.xlu1 %v4207_v4, %s3683_s29  ;;  %v849_v3 = vsel %vm838_vm0, %v2978_v18, %v5519_v38  ;;  %v5521_v46 = vunpack.i.l.bf16 %v4557_v41 }
 0x27e   : > { %v2532_v45 = vpack.c.bf16 %v848_v56, %v845_v55  ;;  %v2986_v39 = vpop.permute.xlu0 %2985  ;;  %v2530_v57 = vpack.c.bf16 %v849_v3, %v846_v34 }
 0x27f   : > { %v4581_v30 = vsel %vm951_vm1, %v5521_v46, %v3063_v12  ;;  %v4583_v42 = vpop.permute.xlu1 %3070  ;;  %v2988_v3 = vunpack.i.h.bf16 %v2986_v39  ;;  %v2987_v9 = vunpack.i.l.bf16 %v2986_v39 }
 0x280   : > { %v2658_v58 = vpack.c.bf16 %v4581_v30, %v4576_v43  ;;  %3315 = vrot.lane.b32.xlu0 %v4201_v21, %s3686_s27  ;;  %2531 = vmatprep.subr.bf16.mxu0 %v2530_v57  ;;  %v5522_v21 = vunpack.i.l.bf16 %v4444_v60 }
 0x281   : > { %3320 = vrot.lane.b32.xlu1 %v4177_v16, %s3686_s27  ;;  %2533 = vmatpush1.bf16.msra.mxu0 %v2532_v45  ;;  %v851_v55 = vsel %vm838_vm0, %v2987_v9, %v2988_v3  ;;  %v5523_v45 = vunpack.i.l.bf16 %v4461_v25 }
 0x282   : > { %v2996_v54 = vpop.permute.xlu0 %2995  ;;  %v852_v16 = vsel %vm838_vm0, %v2988_v3, %v5522_v21  ;;  %v5525_v21 = vunpack.i.l.bf16 %v4493_v33 }
 0x283   : > { %v2998_v40 = vunpack.i.h.bf16 %v2996_v54  ;;  %v2997_v18 = vunpack.i.l.bf16 %v2996_v54  ;;  %v4591_v12 = vpop.permute.xlu1 %3080 }
 0x284   : > { %3330 = vrot.lane.b32.xlu0 %v4124_v62, %s3682_s23 }
 0x285   : > { %v854_v56 = vsel %vm838_vm0, %v2997_v18, %v2998_v40  ;;  %3325 = vrot.lane.b32.xlu1 %v4121_v29, %s3682_s23  ;;  %v855_v57 = vsel %vm838_vm0, %v2998_v40, %v5523_v45 }
 0x286   : > { %v2536_v39 = vpack.c.bf16 %v854_v56, %v851_v55  ;;  %v3006_v13 = vpop.permute.xlu0 %3005  ;;  %v2534_v34 = vpack.c.bf16 %v855_v57, %v852_v16  ;;  %v5524_v55 = vunpack.i.l.bf16 %v4476_v15 }
 0x287   : > { %v4605_v38 = vpop.permute.xlu1 %3090  ;;  %v3008_v46 = vunpack.i.h.bf16 %v3006_v13  ;;  %v3007_v9 = vunpack.i.l.bf16 %v3006_v13 }
 0x288   : > { %3340 = vrot.lane.b32.xlu0 %v4217_v7, %s3682_s23  ;;  %2535 = vmatprep.subr.bf16.mxu0 %v2534_v34 }
 0x289   : > { %3335 = vrot.lane.b32.xlu1 %v4185_v17, %s3683_s29  ;;  %2537 = vmatpush1.bf16.msra.mxu0 %v2536_v39  ;;  %v857_v40 = vsel %vm838_vm0, %v3007_v9, %v3008_v46  ;;  %v858_v56 = vsel %vm838_vm0, %v3008_v46, %v5524_v55 }
 0x28a   : > { %v3016_v60 = vpop.permute.xlu0 %3015 }
 0x28b   : > { %v3018_v3 = vunpack.i.h.bf16 %v3016_v60  ;;  %v3017_v25 = vunpack.i.l.bf16 %v3016_v60  ;;  %v4611_v54 = vpop.permute.xlu1 %3105 }
 0x28c   : > { %3345 = vrot.lane.b32.xlu0 %v4133_v2, %s3684_s28 }
 0x28d   : > { %v860_v18 = vsel %vm838_vm0, %v3017_v25, %v3018_v3  ;;  %3350 = vrot.lane.b32.xlu1 %v4104_v47, %s3684_s28  ;;  %v861_v16 = vsel %vm838_vm0, %v3018_v3, %v5525_v21  ;;  %v5526_v3 = vunpack.i.l.bf16 %v4508_v63 }
 0x28e   : > { %v2540_v45 = vpack.c.bf16 %v860_v18, %v857_v40  ;;  %v3026_v57 = vpop.permute.xlu0 %3025  ;;  %v2538_v39 = vpack.c.bf16 %v861_v16, %v858_v56  ;;  %v5527_v40 = vunpack.i.l.bf16 %v4518_v31 }
 0x28f   : > { %v4625_v13 = vpop.permute.xlu1 %3110  ;;  %v3028_v2 = vunpack.i.h.bf16 %v3026_v57  ;;  %v3027_v34 = vunpack.i.l.bf16 %v3026_v57 }
 0x290   : > { %3355 = vrot.lane.b32.xlu0 %v4197_v20, %s3686_s27  ;;  %2539 = vmatprep.subr.bf16.mxu0 %v2538_v39 }
 0x291   : > { %3360 = vrot.lane.b32.xlu1 %v4223_v10, %s3682_s23  ;;  %2541 = vmatpush1.bf16.msra.mxu0 %v2540_v45  ;;  %v952_v9 = vsel %vm951_vm1, %v3027_v34, %v3028_v2  ;;  %v953_v25 = vsel %vm951_vm1, %v3028_v2, %v5526_v3  ;;  %v5528_v34 = vunpack.i.l.bf16 %v4547_v36  ;;  %v3072_v36 = vunpack.i.l.bf16 %v4583_v42 }
 0x292   : > { %v3036_v47 = vpop.permute.xlu0 %3035 }
 0x293   : > { %v3038_v15 = vunpack.i.h.bf16 %v3036_v47  ;;  %v3037_v33 = vunpack.i.l.bf16 %v3036_v47  ;;  %v4631_v46 = vpop.permute.xlu1 %3120 }
 0x294   : > { %3370 = vrot.lane.b32.xlu0 %v4110_v49, %s3684_s28 }
 0x295   : > { %v955_v60 = vsel %vm951_vm1, %v3037_v33, %v3038_v15  ;;  %3365 = vrot.lane.b32.xlu1 %v4107_v48, %s3684_s28  ;;  %v956_v18 = vsel %vm951_vm1, %v3038_v15, %v5527_v40  ;;  %v5529_v15 = vunpack.i.l.bf16 %v4557_v41  ;;  %v3082_v41 = vunpack.i.l.bf16 %v4591_v12 }
 0x296   : > { %v2544_v55 = vpack.c.bf16 %v955_v60, %v952_v9  ;;  %v3046_v56 = vpop.permute.xlu0 %3045  ;;  %v2542_v21 = vpack.c.bf16 %v956_v18, %v953_v25 }
 0x297   : > { %v4645_v16 = vpop.permute.xlu1 %3130  ;;  %v3048_v49 = vunpack.i.h.bf16 %v3046_v56  ;;  %v3047_v45 = vunpack.i.l.bf16 %v3046_v56 }
 0x298   : > { %3380 = vrot.lane.b32.xlu0 %v4227_v14, %s3682_s23  ;;  %2543 = vmatprep.subr.bf16.mxu0 %v2542_v21  ;;  %v3123_v21 = vunpack.i.h.bf16 %v4631_v46 }
 0x299   : > { %3375 = vrot.lane.b32.xlu1 %v4203_v22, %s3686_s27  ;;  %2545 = vmatpush1.bf16.msra.mxu0 %v2544_v55  ;;  %v958_v39 = vsel %vm951_vm1, %v3047_v45, %v3048_v49  ;;  %v959_v47 = vsel %vm951_vm1, %v3048_v49, %v5528_v34  ;;  %v2837_v34 = vunpack.i.l.bf16 %v4329_v5 }
 0x29a   : > { %v3056_v48 = vpop.permute.xlu0 %3055 }
 0x29b   : > { %v3058_v63 = vunpack.i.h.bf16 %v3056_v48  ;;  %v3057_v31 = vunpack.i.l.bf16 %v3056_v48  ;;  %v4651_v57 = vpop.permute.xlu1 %3140 }
 0x29c   : > { %3385 = vrot.lane.b32.xlu0 %v4113_v50, %s3684_s28 }
 0x29d   : > { %v961_v2 = vsel %vm951_vm1, %v3057_v31, %v3058_v63  ;;  %3390 = vrot.lane.b32.xlu1 %v4116_v61, %s3684_s28  ;;  %v962_v33 = vsel %vm951_vm1, %v3058_v63, %v5529_v15  ;;  %v2838_v31 = vunpack.i.h.bf16 %v4329_v5 }
 0x29e   : > { %v2548_v9 = vpack.c.bf16 %v961_v2, %v958_v39  ;;  %v3066_v60 = vpop.permute.xlu0 %3065  ;;  %v2546_v3 = vpack.c.bf16 %v962_v33, %v959_v47  ;;  %v3122_v47 = vunpack.i.l.bf16 %v4631_v46 }
 0x29f   : > { %v4665_v25 = vpop.permute.xlu1 %3150  ;;  %v3068_v50 = vunpack.i.h.bf16 %v3066_v60  ;;  %v3067_v40 = vunpack.i.l.bf16 %v3066_v60  ;;  %v973_v60 = vsel %vm951_vm1, %v2838_v31, %v3123_v21 }
 0x2a0   : > { %3395 = vrot.lane.b32.xlu0 %v4207_v4, %s3686_s27  ;;  %2547 = vmatprep.subr.bf16.mxu0 %v2546_v3  ;;  %v5472_v3 = vunpack.i.h.bf16 %v4605_v38 }
 0x2a1   : > { %3400 = vrot.lane.b32.xlu1 %v4233_v26, %s3682_s23  ;;  %2549 = vmatpush1.bf16.msra.mxu0 %v2548_v9  ;;  %v964_v49 = vsel %vm951_vm1, %v3067_v40, %v3068_v50  ;;  %v965_v48 = vsel %vm951_vm1, %v3068_v50, %v3072_v36  ;;  %v3092_v9 = vunpack.i.l.bf16 %v4605_v38  ;;  %s3597_s23 = sshll.u32 %s3691_s13, 4  ;;  %s3598_s23 = int_to_ptr.vmem [resolvable:$false] %s3597_s23 }
 0x2a2   : > { %v3076_v61 = vpop.permute.xlu0 %3075  ;;  %s3599_s29 = scalar_lea.vmem %s3598_s23, 768  ;;  %p3600_p4 = scmp.lt.s32.totalorder %s5381_s11, %s3598_s23 }
 0x2a3   : > { %v3078_v18 = vunpack.i.h.bf16 %v3076_v61  ;;  %v3077_v55 = vunpack.i.l.bf16 %v3076_v61  ;;  %v4673_v56 = vpop.permute.xlu1 %3155  ;;  %v974_v61 = vsel %vm951_vm1, %v3123_v21, %v2837_v34  ;;  %v5470_v21 = vunpack.i.h.bf16 %v4611_v54  ;;  %p3601_p5 = scmp.lt.s32.totalorder %s3599_s29, %s3593_s22 }
 0x2a4   : > { %3410 = vrot.lane.b32.xlu0 %v4124_v62, %s3684_s28 }
 0x2a5   : > { %v967_v45 = vsel %vm951_vm1, %v3077_v55, %v3078_v18  ;;  %3405 = vrot.lane.b32.xlu1 %v4121_v29, %s3684_s28  ;;  %v968_v63 = vsel %vm951_vm1, %v3078_v18, %v3082_v41  ;;  %v2827_v18 = vunpack.i.l.bf16 %v4323_v1  ;;  %p3602_p3 = por %p3601_p5, %p3600_p4 }
 0x2a6   : > { %v2552_v39 = vpack.c.bf16 %v967_v45, %v964_v49  ;;  %v3086_v2 = vpop.permute.xlu0 %3085  ;;  %v2550_v62 = vpack.c.bf16 %v968_v63, %v965_v48  ;;  %v2828_v45 = vunpack.i.h.bf16 %v4323_v1  ;;  %v1631_v1 = vsel %vm1629_vm2, %v3092_v9, %v5472_v3  ;;  %v4823_v3 = vld [vmem:[#allocation8 + $0x20] sm:$0xff] }
 0x2a7   : > { %v3088_v15 = vunpack.i.h.bf16 %v3086_v2  ;;  %v3087_v33 = vunpack.i.l.bf16 %v3086_v2  ;;  %v4691_v29 = vpop.permute.xlu1 %3170  ;;  %v3107_v2 = vunpack.i.l.bf16 %v4611_v54  ;;  %p3603_p7 = pnand %p3602_p3, %p3596_p10 }
 0x2a8   : > { %3420 = vrot.lane.b32.xlu0 %v4217_v7, %s3684_s28  ;;  %2551 = vmatprep.subr.bf16.mxu0 %v2550_v62 }
 0x2a9   : > { %v970_v50 = vsel %vm951_vm1, %v3087_v33, %v3088_v15  ;;  %3415 = vrot.lane.b32.xlu1 %v4185_v17, %s3686_s27  ;;  %2553 = vmatpush1.bf16.msra.mxu0 %v2552_v39  ;;  %v971_v40 = vsel %vm951_vm1, %v3088_v15, %v3122_v47  ;;  %v1630_v39 = vsel %vm1629_vm2, %v2827_v18, %v3092_v9  ;;  %v2833_v33 = vunpack.i.h.bf16 %v4321_v0 }
 0x2aa   : > { %v2556_v7 = vpack.c.bf16 %v973_v60, %v970_v50  ;;  %v4708_v55 = vpop.permute.xlu0 %3095  ;;  %v2554_v49 = vpack.c.bf16 %v974_v61, %v971_v40  ;;  %v2832_v40 = vunpack.i.l.bf16 %v4321_v0 }
 0x2ab   : > { %v5473_v48 = vunpack.i.h.bf16 %v4708_v55  ;;  %v3097_v63 = vunpack.i.l.bf16 %v4708_v55  ;;  %v4713_v31 = vpop.permute.xlu1 %3175  ;;  %v1639_v9 = vsel %vm1629_vm2, %v2833_v33, %v3107_v2 }
 0x2ac   : > { %3425 = vrot.lane.b32.xlu0 %v4223_v10, %s3684_s28  ;;  %2555 = vmatprep.subr.bf16.mxu0 %v2554_v49  ;;  %v5466_v49 = vunpack.i.h.bf16 %v4625_v13 }
 0x2ad   : > { %v1633_v62 = vsel %vm1629_vm2, %v2828_v45, %v3097_v63  ;;  %3430 = vrot.lane.b32.xlu1 %v4197_v20, %s3679_s24  ;;  %2557 = vmatpush1.bf16.msra.mxu0 %v2556_v7  ;;  %v1634_v15 = vsel %vm1629_vm2, %v3097_v63, %v5473_v48  ;;  %v3112_v7 = vunpack.i.l.bf16 %v4625_v13  ;;  %v1640_v63 = vsel %vm1629_vm2, %v3107_v2, %v5470_v21 }
 0x2ae   : > { %v2640_v10 = vpack.c.bf16 %v1633_v62, %v1630_v39  ;;  %v4730_v60 = vpop.permute.xlu0 %3100  ;;  %v2638_v50 = vpack.c.bf16 %v1634_v15, %v1631_v1  ;;  %v2842_v39 = vunpack.i.l.bf16 %v4331_v6  ;;  %v2843_v15 = vunpack.i.h.bf16 %v4331_v6 }
 0x2af   : > { %v5471_v61 = vunpack.i.h.bf16 %v4730_v60  ;;  %v3102_v20 = vunpack.i.l.bf16 %v4730_v60  ;;  %v4735_v18 = vpop.permute.xlu1 %3185  ;;  %v5468_v2 = vunpack.i.h.bf16 %v4645_v16  ;;  %v1643_v6 = vsel %vm1629_vm2, %v3112_v7, %v5466_v49 }
 0x2b0   : > { %3440 = vrot.lane.b32.xlu0 %v4203_v22, %s3679_s24  ;;  %2639 = vmatprep.subr.bf16.mxu1 %v2638_v50  ;;  %v1642_v50 = vsel %vm1629_vm2, %v2842_v39, %v3112_v7 }
 0x2b1   : > { %v1636_v45 = vsel %vm1629_vm2, %v2832_v40, %v3102_v20  ;;  %3435 = vrot.lane.b32.xlu1 %v4227_v14, %s3684_s28  ;;  %2641 = vmatpush1.bf16.msra.mxu1 %v2640_v10  ;;  %v1637_v0 = vsel %vm1629_vm2, %v3102_v20, %v5471_v61  ;;  %v3132_v40 = vunpack.i.l.bf16 %v4645_v16  ;;  %v3152_v61 = vunpack.i.l.bf16 %v4665_v25 }
 0x2b2   : > { %v2644_v22 = vpack.c.bf16 %v1639_v9, %v1636_v45  ;;  %v4752_v62 = vpop.permute.xlu0 %3115  ;;  %v2642_v1 = vpack.c.bf16 %v1640_v63, %v1637_v0  ;;  %v2848_v45 = vunpack.i.h.bf16 %v4337_v23 }
 0x2b3   : > { %v5469_v33 = vunpack.i.h.bf16 %v4752_v62  ;;  %v3117_v14 = vunpack.i.l.bf16 %v4752_v62  ;;  %v4757_v10 = vpop.permute.xlu1 %3190 }
 0x2b4   : > { %3445 = vrot.lane.b32.xlu0 %v4233_v26, %s3684_s28  ;;  %2643 = vmatprep.subr.bf16.mxu1 %v2642_v1  ;;  %v2847_v26 = vunpack.i.l.bf16 %v4337_v23  ;;  %v3688_v1 = vmov 0   ;;  %v2857_v23 = vunpack.i.l.bf16 %v4345_v24  ;;  %v3193_v30 = vunpack.i.h.bf16 %v4757_v10 }
 0x2b5   : > { %v1645_v20 = vsel %vm1629_vm2, %v2843_v15, %v3117_v14  ;;  %3455 = vrot.lane.b32.xlu1 %v4207_v4, %s3679_s24  ;;  %2645 = vmatpush1.bf16.msra.mxu1 %v2644_v22  ;;  %v1646_v9 = vsel %vm1629_vm2, %v3117_v14, %v5469_v33  ;;  %v2853_v4 = vunpack.i.h.bf16 %v4339_v11  ;;  %v2852_v22 = vunpack.i.l.bf16 %v4339_v11 }
 0x2b6   : > { %v2648_v0 = vpack.c.bf16 %v1645_v20, %v1642_v50  ;;  %v4775_v63 = vpop.permute.xlu0 %3125  ;;  %v2646_v39 = vpack.c.bf16 %v1646_v9, %v1643_v6  ;;  %3464 = vset.pattern.permute.xlu0 %v3688_v1  ;;  %v2858_v14 = vunpack.i.h.bf16 %v4345_v24  ;;  %v1651_v50 = vsel %vm1629_vm2, %v2848_v45, %v3132_v40 }
 0x2b7   : > { %v5467_v7 = vunpack.i.h.bf16 %v4775_v63  ;;  %v3127_v15 = vunpack.i.l.bf16 %v4775_v63  ;;  %v4781_v49 = vpop.permute.xlu1 %3200  ;;  %v3142_v20 = vunpack.i.l.bf16 %v4651_v57  ;;  %v3143_v11 = vunpack.i.h.bf16 %v4651_v57 }
 0x2b8   : > { %3450 = vrot.lane.b32.xlu0 %v4087_v37, %s3684_s28  ;;  %2647 = vmatprep.subr.bf16.mxu1 %v2646_v39  ;;  %v1652_v9 = vsel %vm1629_vm2, %v3132_v40, %v5468_v2  ;;  %v1683_v37 = vld [vmem:[%s5427_s4] sm:$0xff]  ;;  %v2863_v45 = vunpack.i.h.bf16 %v4347_v27 }
 0x2b9   : > { %v1648_v6 = vsel %vm1629_vm2, %v2847_v26, %v3127_v15  ;;  %3460 = vrot.lane.b32.xlu1 %v4185_v17, %s3679_s24  ;;  %2649 = vmatpush1.bf16.msra.mxu1 %v2648_v0  ;;  %v1649_v24 = vsel %vm1629_vm2, %v3127_v15, %v5467_v7  ;;  %v2862_v26 = vunpack.i.l.bf16 %v4347_v27  ;;  %v2868_v0 = vunpack.i.h.bf16 %v4353_v28  ;;  %s5379_s24 = scalar_lea.hbm %s5428_s5, %s2737_s10 }
 0x2ba   : > { %v2652_v39 = vpack.c.bf16 %v1651_v50, %v1648_v6  ;;  %v4804_v1 = vpop.permute.xlu0 %3135  ;;  %v2650_v17 = vpack.c.bf16 %v1652_v9, %v1649_v24  ;;  %v3083_v15 = vunpack.i.h.bf16 %v4591_v12  ;;  %v1068_v21 = vsel %vm1064_vm3, %v2853_v4, %v3142_v20 }
 0x2bb   : > { %v5474_v7 = vunpack.i.h.bf16 %v4804_v1  ;;  %v3137_v40 = vunpack.i.l.bf16 %v4804_v1  ;;  %v4810_v2 = vpop.permute.xlu1 %3205  ;;  %v3153_v50 = vunpack.i.h.bf16 %v4665_v25  ;;  %v1069_v9 = vsel %vm1064_vm3, %v3142_v20, %v3143_v11  ;;  %v5543_v25 = vld [vmem:[#allocation27_spill] sm:$0xff] }
 0x2bc   : > { %2651 = vmatprep.subr.bf16.mxu1 %v2650_v17  ;;  %1686 = vperm.xlu0 %3464, %v1683_v37   ;;  %v3073_v17 = vunpack.i.h.bf16 %v4583_v42  ;;  %v969_v4 = vsel %vm951_vm1, %v3082_v41, %v3083_v15  ;;  %v5531_v12 = vpack.c.bf16 %v4011_v51, %v4003_v44  ;;  %v3172_v15 = vunpack.i.l.bf16 %v4691_v29 }
 0x2bd   : > { %v1065_v6 = vsel %vm1064_vm3, %v2852_v22, %v3137_v40  ;;  %2653 = vmatpush1.bf16.msra.mxu1 %v2652_v39  ;;  %v1066_v24 = vsel %vm1064_vm3, %v3137_v40, %v5474_v7  ;;  %v5530_v22 = vpack.c.bf16 %v4545_v19, %v4540_v59  ;;  %v2872_v40 = vunpack.i.l.bf16 %v4361_v32 }
 0x2be   : > { %v2560_v37 = vpack.c.bf16 %v1068_v21, %v1065_v6  ;;  %v4827_v48 = vpop.permute.xlu0 %3145  ;;  %v2558_v39 = vpack.c.bf16 %v1069_v9, %v1066_v24  ;;  %v1074_v21 = vsel %vm1064_vm3, %v2858_v14, %v3152_v61  ;;  %v3158_v6 = vunpack.i.h.bf16 %v4673_v56 }
 0x2bf   : > { %2655 = vmatprep.subr.bf16.mxu1 %v5530_v22  ;;  %v3148_v7 = vunpack.i.h.bf16 %v4827_v48  ;;  %v3147_v20 = vunpack.i.l.bf16 %v4827_v48  ;;  %v4835_v33 = vpop.permute.xlu1 %3215  ;;  %v3157_v59 = vunpack.i.l.bf16 %v4673_v56  ;;  %v3177_v19 = vunpack.i.l.bf16 %v4713_v31 }
 0x2c0   : > { %2559 = vmatprep.subr.bf16.mxu0 %v2558_v39  ;;  %2277 = vmatmul.mubr.msk.f32.vlgmr.msra.gmra.mrb[2].mxu1 %vm1689_vm4, %v4823_v3  ;;  %v3178_v24 = vunpack.i.h.bf16 %v4713_v31  ;;  %v1075_v14 = vsel %vm1064_vm3, %v3152_v61, %v3153_v50  ;;  %v966_v44 = vsel %vm951_vm1, %v3072_v36, %v3073_v17  ;;  %v3173_v51 = vunpack.i.h.bf16 %v4691_v29 }
 0x2c1   : > { %v1071_v9 = vsel %vm1064_vm3, %v2857_v23, %v3147_v20  ;;  %2561 = vmatpush1.bf16.msra.mxu0 %v2560_v37  ;;  %2657 = vmatpush3.bf16.msra.mxu1 %v5531_v12  ;;  %v1072_v41 = vsel %vm1064_vm3, %v3147_v20, %v3148_v7  ;;  %v2662_v20 = vpack.c.bf16 %v969_v4, %v966_v44 }
 0x2c2   : > { %v2564_v22 = vpack.c.bf16 %v1074_v21, %v1071_v9  ;;  %v4858_v31 = vpop.permute.xlu0 %3160  ;;  %2659 = vmatprep.subr.bf16.mxu1 %v2658_v58  ;;  %v2562_v23 = vpack.c.bf16 %v1075_v14, %v1072_v41  ;;  %1970 = vmatprep.mubr.f32.mxu1 %v4396_v8  ;;  %v1077_v21 = vsel %vm1064_vm3, %v2862_v26, %v3157_v59  ;;  %v2878_v58 = vunpack.i.h.bf16 %v4370_v35  ;;  %v5533_v9 = vld [vmem:[#allocation23_spill] sm:$0xff] }
 0x2c3   : > { %v3163_v37 = vunpack.i.h.bf16 %v4858_v31  ;;  %v3162_v61 = vunpack.i.l.bf16 %v4858_v31  ;;  %v4869_v39 = vpop.permute.xlu1 %3220  ;;  %v1078_v43 = vsel %vm1064_vm3, %v3157_v59, %v3158_v6  ;;  %v972_v42 = vsel %vm951_vm1, %v3122_v47, %v3177_v19 }
 0x2c4   : > { %2563 = vmatprep.subr.bf16.mxu0 %v2562_v23  ;;  %v5532_v8 = vpack.c.bf16 %v4015_v53, %v4013_v52  ;;  %v975_v46 = vsel %vm951_vm1, %v2837_v34, %v3178_v24  ;;  %v2877_v47 = vunpack.i.l.bf16 %v4370_v35  ;;  %v1086_v27 = vsel %vm1064_vm3, %v2868_v0, %v3172_v15  ;;  %v5536_v23 = vld [vmem:[#allocation17_spill] sm:$0xff] }
 0x2c5   : > { %v1080_v36 = vsel %vm1064_vm3, %v2863_v45, %v3162_v61  ;;  %2565 = vmatpush1.bf16.msra.mxu0 %v2564_v22  ;;  %v1081_v26 = vsel %vm1064_vm3, %v3162_v61, %v3163_v37  ;;  %v3192_v53 = vunpack.i.l.bf16 %v4757_v10  ;;  %v1087_v34 = vsel %vm1064_vm3, %v3172_v15, %v3173_v51  ;;  %v5535_v22 = vld [vmem:[#allocation18_spill] sm:$0xff] }
 0x2c6   : > { %2661 = vmatpush3.bf16.msra.mxu1 %v5532_v8  ;;  %v2568_v45 = vpack.c.bf16 %v1080_v36, %v1077_v21  ;;  %v4897_v4 = vpop.permute.xlu0 %3165  ;;  %v2566_v52 = vpack.c.bf16 %v1081_v26, %v1078_v43  ;;  %v3188_v19 = vunpack.i.h.bf16 %v4735_v18  ;;  %v3187_v0 = vunpack.i.l.bf16 %v4735_v18  ;;  %v5557_v18 = vld [vmem:[#allocation28_spill] sm:$0xff] }
 0x2c7   : > { %2663 = vmatprep.subr.bf16.mxu1 %v2662_v20  ;;  %v3168_v17 = vunpack.i.h.bf16 %v4897_v4  ;;  %v3167_v59 = vunpack.i.l.bf16 %v4897_v4  ;;  %v4902_v5 = vpop.permute.xlu1 %3230  ;;  %v2666_v24 = vpack.c.bf16 %v975_v46, %v972_v42  ;;  %v1070_v10 = vsel %vm1064_vm3, %v3143_v11, %v3193_v30  ;;  %v5549_v4 = vld [vmem:[#allocation25_spill] sm:$0xff] }
 0x2c8   : > { %2567 = vmatprep.subr.bf16.mxu0 %v2566_v52  ;;  %v2883_v12 = vunpack.i.h.bf16 %v5533_v9  ;;  %v5534_v41 = vunpack.i.l.bf16 %v4353_v28  ;;  %v5537_v15 = vpack.c.bf16 %v5535_v22, %v5536_v23  ;;  %v5538_v61 = vunpack.i.h.bf16 %v4804_v1 }
 0x2c9   : > { %2569 = vmatpush1.bf16.msra.mxu0 %v2568_v45  ;;  %v1084_v44 = vsel %vm1064_vm3, %v3167_v59, %v3168_v17  ;;  %v3203_v11 = vunpack.i.h.bf16 %v4781_v49  ;;  %v3202_v20 = vunpack.i.l.bf16 %v4781_v49  ;;  %v3208_v43 = vunpack.i.h.bf16 %v4810_v2 }
 0x2ca   : > { %v1083_v14 = vsel %vm1064_vm3, %v5534_v41, %v3167_v59  ;;  %2665 = vmatpush3.bf16.msra.mxu1 %v5537_v15  ;;  %v1067_v57 = vsel %vm1064_vm3, %v5538_v61, %v3192_v53  ;;  %v4927_v21 = vpop.permute.xlu0 %3180  ;;  %v2570_v30 = vpack.c.bf16 %v1087_v34, %v1084_v44  ;;  %v3207_v42 = vunpack.i.l.bf16 %v4810_v2  ;;  %v5540_v59 = vld [vmem:[#allocation16_spill] sm:$0xff]  ;;  %v5541_v34 = vld [vmem:[#allocation19_spill] sm:$0xff] }
 0x2cb   : > { %v2572_v28 = vpack.c.bf16 %v1086_v27, %v1083_v14  ;;  %2667 = vmatprep.subr.bf16.mxu1 %v2666_v24  ;;  %v3183_v36 = vunpack.i.h.bf16 %v4927_v21  ;;  %v3182_v8 = vunpack.i.l.bf16 %v4927_v21  ;;  %v3236_v1 = vpop.permute.xlu1 %3235  ;;  %v5539_v26 = vunpack.i.h.bf16 %v4361_v32 }
 0x2cc   : > { %v3222_v45 = vunpack.i.l.bf16 %v4869_v39  ;;  %2571 = vmatprep.subr.bf16.mxu0 %v2570_v30  ;;  %v2670_v27 = vpack.c.bf16 %v1070_v10, %v1067_v57  ;;  %v1182_v52 = vsel %vm1177_vm5, %v3187_v0, %v3188_v19  ;;  %v3223_v53 = vunpack.i.h.bf16 %v4869_v39  ;;  %v4950_v10 = vld [vmem:[#allocation8] sm:$0xff] }
 0x2cd   : > { %v1181_v46 = vsel %vm1177_vm5, %v5539_v26, %v3187_v0  ;;  %v1178_v2 = vsel %vm1177_vm5, %v2872_v40, %v3182_v8  ;;  %2573 = vmatpush1.bf16.msra.mxu0 %v2572_v28  ;;  %v5542_v24 = vpack.c.bf16 %v5540_v59, %v5541_v34  ;;  %v1179_v41 = vsel %vm1177_vm5, %v3182_v8, %v3183_v36  ;;  %v5547_v59 = vld [vmem:[#allocation29_spill] sm:$0xff] }
 0x2ce   : > { %v1073_v0 = vsel %vm1064_vm3, %v3148_v7, %v3207_v42  ;;  %v1187_v39 = vsel %vm1177_vm5, %v2878_v58, %v3202_v20  ;;  %v2576_v32 = vpack.c.bf16 %v1181_v46, %v1178_v2  ;;  %v4956_v14 = vpop.permute.xlu0 %3195  ;;  %v2574_v40 = vpack.c.bf16 %v1182_v52, %v1179_v41  ;;  %v5544_v42 = vld [vmem:[#allocation40_spill] sm:$0xff]  ;;  %v5546_v2 = vld [vmem:[#allocation31_spill] sm:$0xff] }
 0x2cf   : > { %2669 = vmatpush3.bf16.msra.mxu1 %v5542_v24  ;;  %v1188_v22 = vsel %vm1177_vm5, %v3202_v20, %v3203_v11  ;;  %v3217_v23 = vunpack.i.l.bf16 %v4835_v33  ;;  %v3198_v15 = vunpack.i.h.bf16 %v4956_v14  ;;  %v3197_v44 = vunpack.i.l.bf16 %v4956_v14  ;;  %v4964_v48 = vpop.permute.xlu1 %3245 }
 0x2d0   : > { %2671 = vmatprep.subr.bf16.mxu1 %v2670_v27  ;;  %v1076_v7 = vsel %vm1064_vm3, %v3153_v50, %v3208_v43  ;;  %v3218_v58 = vunpack.i.h.bf16 %v4835_v33  ;;  %v3237_v61 = vunpack.i.l.bf16 %v3236_v1  ;;  %2575 = vmatprep.subr.bf16.mxu0 %v2574_v40  ;;  %v1079_v20 = vsel %vm1064_vm3, %v3158_v6, %v3222_v45 }
 0x2d1   : > { %1758 = vmatmul.mubr.f32.vlgmr.msra.gmra.mrb[2].mxu0 %v4950_v10  ;;  %v2674_v57 = vpack.c.bf16 %v1076_v7, %v1073_v0  ;;  %v3238_v28 = vunpack.i.h.bf16 %v3236_v1  ;;  %v1184_v30 = vsel %vm1177_vm5, %v2877_v47, %v3197_v44  ;;  %v5545_v50 = vpack.c.bf16 %v5543_v25, %v5544_v42  ;;  %v4988_v1 = vld [vmem:[#allocation8 + $0x18] sm:$0xff] }
 0x2d2   : > { %2577 = vmatpush1.bf16.msra.mxu0 %v2576_v32  ;;  %v1185_v43 = vsel %vm1177_vm5, %v3197_v44, %v3198_v15  ;;  %v1082_v56 = vsel %vm1064_vm3, %v3163_v37, %v3223_v53  ;;  %v2580_v8 = vpack.c.bf16 %v1187_v39, %v1184_v30  ;;  %v4986_v6 = vpop.permute.xlu0 %3210  ;;  %v2882_v47 = vunpack.i.l.bf16 %v5533_v9  ;;  %1828 = vmatprep.mubr.f32.mxu0 %v4988_v1 }
 0x2d3   : > { %2673 = vmatpush3.bf16.msra.mxu1 %v5545_v50  ;;  %v2578_v35 = vpack.c.bf16 %v1188_v22, %v1185_v43  ;;  %v1193_v26 = vsel %vm1177_vm5, %v2883_v12, %v3217_v23  ;;  %v3213_v46 = vunpack.i.h.bf16 %v4986_v6  ;;  %v3212_v45 = vunpack.i.l.bf16 %v4986_v6  ;;  %v4994_v27 = vpop.permute.xlu1 %3250  ;;  %v5553_v50 = vld [vmem:[#allocation26_spill] sm:$0xff] }
 0x2d4   : > { %2675 = vmatprep.subr.bf16.mxu1 %v2674_v57  ;;  %v3232_v31 = vunpack.i.l.bf16 %v4902_v5  ;;  %v2678_v37 = vpack.c.bf16 %v1082_v56, %v1079_v20  ;;  %v1194_v52 = vsel %vm1177_vm5, %v3217_v23, %v3218_v58  ;;  %v1085_v9 = vsel %vm1064_vm3, %v3168_v17, %v3237_v61  ;;  %v5550_v20 = vld [vmem:[#allocation35_spill] sm:$0xff] }
 0x2d5   : > { %2579 = vmatprep.subr.bf16.mxu0 %v2578_v35  ;;  %v3233_v12 = vunpack.i.h.bf16 %v4902_v5  ;;  %v1190_v53 = vsel %vm1177_vm5, %v2882_v47, %v3212_v45  ;;  %v5548_v34 = vpack.c.bf16 %v5546_v2, %v5547_v59  ;;  %v1191_v24 = vsel %vm1177_vm5, %v3212_v45, %v3213_v46 }
 0x2d6   : > { %2581 = vmatpush1.bf16.msra.mxu0 %v2580_v8  ;;  %v1088_v41 = vsel %vm1064_vm3, %v3173_v51, %v3238_v28  ;;  %v2888_v0 = vunpack.i.h.bf16 %v5549_v4  ;;  %v2584_v17 = vpack.c.bf16 %v1193_v26, %v1190_v53  ;;  %v5016_v39 = vpop.permute.xlu0 %3225  ;;  %v2582_v32 = vpack.c.bf16 %v1194_v52, %v1191_v24  ;;  %v5551_v28 = vld [vmem:[#allocation33_spill] sm:$0xff]  ;;  %v5554_v24 = vld [vmem:[#allocation39_spill] sm:$0xff] }
 0x2d7   : > { %2677 = vmatpush3.bf16.msra.mxu1 %v5548_v34  ;;  %v2887_v40 = vunpack.i.l.bf16 %v5549_v4  ;;  %v3228_v22 = vunpack.i.h.bf16 %v5016_v39  ;;  %v3227_v23 = vunpack.i.l.bf16 %v5016_v39  ;;  %v3261_v44 = vpop.permute.xlu1 %3260  ;;  %v3248_v29 = vunpack.i.h.bf16 %v4964_v48 }
 0x2d8   : > { %2679 = vmatprep.subr.bf16.mxu1 %v2678_v37  ;;  %v1199_v7 = vsel %vm1177_vm5, %v2888_v0, %v3232_v31  ;;  %v3247_v51 = vunpack.i.l.bf16 %v4964_v48  ;;  %2583 = vmatprep.subr.bf16.mxu0 %v2582_v32  ;;  %v2682_v61 = vpack.c.bf16 %v1088_v41, %v1085_v9  ;;  %v5552_v30 = vpack.c.bf16 %v5550_v20, %v5551_v28  ;;  %v5555_v41 = vld [vmem:[#allocation37_spill] sm:$0xff] }
 0x2d9   : > { %v1196_v57 = vsel %vm1177_vm5, %v2887_v40, %v3227_v23  ;;  %v1197_v25 = vsel %vm1177_vm5, %v3227_v23, %v3228_v22  ;;  %v1200_v42 = vsel %vm1177_vm5, %v3232_v31, %v3233_v12  ;;  %v2893_v43 = vunpack.i.h.bf16 %v5553_v50 }
 0x2da   : > { %2585 = vmatpush1.bf16.msra.mxu0 %v2584_v17  ;;  %v2588_v56 = vpack.c.bf16 %v1199_v7, %v1196_v57  ;;  %v5035_v8 = vpop.permute.xlu0 %3240  ;;  %v2586_v35 = vpack.c.bf16 %v1200_v42, %v1197_v25  ;;  %v2892_v47 = vunpack.i.l.bf16 %v5553_v50  ;;  %v3263_v9 = vunpack.i.h.bf16 %v3261_v44 }
 0x2db   : > { %2681 = vmatpush3.bf16.msra.mxu1 %v5552_v30  ;;  %v3243_v26 = vunpack.i.h.bf16 %v5035_v8  ;;  %v3242_v45 = vunpack.i.l.bf16 %v5035_v8  ;;  %v5040_v37 = vpop.permute.xlu1 %3270  ;;  %v1294_v52 = vsel %vm1290_vm6, %v2893_v43, %v3247_v51  ;;  %v3262_v53 = vunpack.i.l.bf16 %v3261_v44 }
 0x2dc   : > { %2683 = vmatprep.subr.bf16.mxu1 %v2682_v61  ;;  %2587 = vmatprep.subr.bf16.mxu0 %v2586_v35  ;;  %v1295_v31 = vsel %vm1290_vm6, %v3247_v51, %v3248_v29  ;;  %v3253_v2 = vunpack.i.h.bf16 %v4994_v27  ;;  %v3252_v59 = vunpack.i.l.bf16 %v4994_v27  ;;  %v5556_v4 = vpack.c.bf16 %v5554_v24, %v5555_v41 }
 0x2dd   : > { %v1291_v34 = vsel %vm1290_vm6, %v2892_v47, %v3242_v45  ;;  %v1292_v0 = vsel %vm1290_vm6, %v3242_v45, %v3243_v26  ;;  %v1180_v51 = vsel %vm1177_vm5, %v3183_v36, %v3262_v53  ;;  %v1183_v61 = vsel %vm1177_vm5, %v3188_v19, %v3263_v9 }
 0x2de   : > { %2589 = vmatpush1.bf16.msra.mxu0 %v2588_v56  ;;  %v2592_v17 = vpack.c.bf16 %v1294_v52, %v1291_v34  ;;  %v5055_v32 = vpop.permute.xlu0 %3255  ;;  %v2590_v40 = vpack.c.bf16 %v1295_v31, %v1292_v0  ;;  %v3273_v57 = vunpack.i.h.bf16 %v5040_v37  ;;  %v3272_v20 = vunpack.i.l.bf16 %v5040_v37 }
 0x2df   : > { %2685 = vmatpush3.bf16.msra.mxu1 %v5556_v4  ;;  %v3258_v23 = vunpack.i.h.bf16 %v5055_v32  ;;  %v3257_v44 = vunpack.i.l.bf16 %v5055_v32  ;;  %v5059_v7 = vpop.permute.xlu1 %3275  ;;  %v1406_v28 = vsel %vm1403_vm7, %v3252_v59, %v3253_v2  ;;  %v2898_v19 = vunpack.i.h.bf16 %v5557_v18 }
 0x2e0   : > { %2591 = vmatprep.subr.bf16.mxu0 %v2590_v40  ;;  %v2897_v25 = vunpack.i.l.bf16 %v5557_v18  ;;  %v2688_v42 = vpack.c.bf16 %v1183_v61, %v1180_v51  ;;  %v3278_v45 = vunpack.i.h.bf16 %v5059_v7  ;;  %v3277_v52 = vunpack.i.l.bf16 %v5059_v7  ;;  %v5558_v61 = vld [vmem:[#allocation30_spill] sm:$0xff] }
 0x2e1   : > { %v1409_v21 = vsel %vm1403_vm7, %v3257_v44, %v3258_v23  ;;  %v1300_v56 = vsel %vm1290_vm6, %v2898_v19, %v3272_v20 }
 0x2e2   : > { %1971 = vmatmul.mubr.f32.vlgmr.msra.gmra.mrb[4].mxu1 %v4950_v10  ;;  %2593 = vmatpush1.bf16.msra.mxu0 %v2592_v17  ;;  %v5078_v36 = vpop.permute.xlu0 %3265  ;;  %v2686_v30 = vpack.c.bf16 %v1409_v21, %v1406_v28  ;;  %v1412_v51 = vsel %vm1403_vm7, %v3277_v52, %v3278_v45 }
 0x2e3   : > { %2040 = vmatprep.mubr.f32.mxu1 %v4988_v1  ;;  %v3268_v10 = vunpack.i.h.bf16 %v5078_v36  ;;  %v3267_v50 = vunpack.i.l.bf16 %v5078_v36  ;;  %v3286_v43 = vpop.permute.xlu1 %3285  ;;  %v1301_v1 = vsel %vm1290_vm6, %v3272_v20, %v3273_v57 }
 0x2e4   : > { %v3288_v35 = vunpack.i.h.bf16 %v3286_v43  ;;  %v3287_v47 = vunpack.i.l.bf16 %v3286_v43  ;;  %2687 = vmatprep.subr.bf16.mxu1 %v2686_v30 }
 0x2e5   : > { %v1297_v9 = vsel %vm1290_vm6, %v2897_v25, %v3267_v50  ;;  %2689 = vmatpush3.bf16.msra.mxu1 %v2688_v42  ;;  %v1298_v53 = vsel %vm1290_vm6, %v3267_v50, %v3268_v10 }
 0x2e6   : > { %v2596_v31 = vpack.c.bf16 %v1300_v56, %v1297_v9  ;;  %v5093_v2 = vpop.permute.xlu0 %3280  ;;  %v2594_v34 = vpack.c.bf16 %v1301_v1, %v1298_v53  ;;  %v1186_v0 = vsel %vm1177_vm5, %v3198_v15, %v3287_v47  ;;  %v1189_v17 = vsel %vm1177_vm5, %v3203_v11, %v3288_v35 }
 0x2e7   : > { %v3283_v24 = vunpack.i.h.bf16 %v5093_v2  ;;  %v3282_v41 = vunpack.i.l.bf16 %v5093_v2  ;;  %v5097_v4 = vpop.permute.xlu1 %3295  ;;  %v2903_v15 = vunpack.i.h.bf16 %v5558_v61  ;;  %v2902_v11 = vunpack.i.l.bf16 %v5558_v61  ;;  %v5559_v61 = vld [vmem:[#allocation32_spill] sm:$0xff] }
 0x2e8   : > { %v3298_v40 = vunpack.i.h.bf16 %v5097_v4  ;;  %v3297_v23 = vunpack.i.l.bf16 %v5097_v4  ;;  %2595 = vmatprep.subr.bf16.mxu0 %v2594_v34  ;;  %v2692_v28 = vpack.c.bf16 %v1189_v17, %v1186_v0  ;;  %v2908_v6 = vunpack.i.h.bf16 %v5559_v61 }
 0x2e9   : > { %2597 = vmatpush1.bf16.msra.mxu0 %v2596_v31  ;;  %v1415_v14 = vsel %vm1403_vm7, %v3282_v41, %v3283_v24 }
 0x2ea   : > { %v5114_v20 = vpop.permute.xlu0 %3290  ;;  %v2690_v49 = vpack.c.bf16 %v1415_v14, %v1412_v51  ;;  %v1306_v30 = vsel %vm1290_vm6, %v2903_v15, %v3297_v23  ;;  %v1307_v25 = vsel %vm1290_vm6, %v3297_v23, %v3298_v40  ;;  %v2907_v15 = vunpack.i.l.bf16 %v5559_v61 }
 0x2eb   : > { %v3293_v21 = vunpack.i.h.bf16 %v5114_v20  ;;  %v3292_v18 = vunpack.i.l.bf16 %v5114_v20  ;;  %v5119_v19 = vpop.permute.xlu1 %3300 }
 0x2ec   : > { %2691 = vmatprep.subr.bf16.mxu1 %v2690_v49  ;;  %v3303_v50 = vunpack.i.h.bf16 %v5119_v19  ;;  %v3302_v43 = vunpack.i.l.bf16 %v5119_v19 }
 0x2ed   : > { %v1303_v42 = vsel %vm1290_vm6, %v2902_v11, %v3292_v18  ;;  %2693 = vmatpush3.bf16.msra.mxu1 %v2692_v28  ;;  %v1304_v56 = vsel %vm1290_vm6, %v3292_v18, %v3293_v21 }
 0x2ee   : > { %v2600_v35 = vpack.c.bf16 %v1306_v30, %v1303_v42  ;;  %v5131_v47 = vpop.permute.xlu0 %3305  ;;  %v2598_v1 = vpack.c.bf16 %v1307_v25, %v1304_v56  ;;  %v1418_v24 = vsel %vm1403_vm7, %v3302_v43, %v3303_v50 }
 0x2ef   : > { %v3308_v45 = vunpack.i.h.bf16 %v5131_v47  ;;  %v3307_v9 = vunpack.i.l.bf16 %v5131_v47  ;;  %v3311_v53 = vpop.permute.xlu1 %3310 }
 0x2f0   : > { %v3313_v31 = vunpack.i.h.bf16 %v3311_v53  ;;  %v3312_v34 = vunpack.i.l.bf16 %v3311_v53  ;;  %2599 = vmatprep.subr.bf16.mxu0 %v2598_v1 }
 0x2f1   : > { %2601 = vmatpush1.bf16.msra.mxu0 %v2600_v35  ;;  %v1421_v0 = vsel %vm1403_vm7, %v3307_v9, %v3308_v45 }
 0x2f2   : > { %v1192_v17 = vsel %vm1177_vm5, %v3213_v46, %v3312_v34  ;;  %v1195_v23 = vsel %vm1177_vm5, %v3218_v58, %v3313_v31  ;;  %v5147_v51 = vpop.permute.xlu0 %3315  ;;  %v2694_v14 = vpack.c.bf16 %v1421_v0, %v1418_v24  ;;  %v5560_v0 = vld [vmem:[#allocation20_spill] sm:$0xff] }
 0x2f3   : > { %v2696_v49 = vpack.c.bf16 %v1195_v23, %v1192_v17  ;;  %v3318_v11 = vunpack.i.h.bf16 %v5147_v51  ;;  %v3317_v28 = vunpack.i.l.bf16 %v5147_v51  ;;  %v5152_v18 = vpop.permute.xlu1 %3320  ;;  %v2913_v17 = vunpack.i.h.bf16 %v5560_v0 }
 0x2f4   : > { %v3323_v46 = vunpack.i.h.bf16 %v5152_v18  ;;  %v3322_v33 = vunpack.i.l.bf16 %v5152_v18  ;;  %2695 = vmatprep.subr.bf16.mxu1 %v2694_v14  ;;  %v2912_v61 = vunpack.i.l.bf16 %v5560_v0 }
 0x2f5   : > { %v1309_v58 = vsel %vm1290_vm6, %v2907_v15, %v3317_v28  ;;  %2697 = vmatpush3.bf16.msra.mxu1 %v2696_v49  ;;  %v1310_v30 = vsel %vm1290_vm6, %v3317_v28, %v3318_v11 }
 0x2f6   : > { %v1312_v25 = vsel %vm1290_vm6, %v2908_v6, %v3322_v33  ;;  %v5162_v42 = vpop.permute.xlu0 %3330  ;;  %v1313_v50 = vsel %vm1290_vm6, %v3322_v33, %v3323_v46 }
 0x2f7   : > { %v2604_v56 = vpack.c.bf16 %v1312_v25, %v1309_v58  ;;  %v3333_v35 = vunpack.i.h.bf16 %v5162_v42  ;;  %v3332_v1 = vunpack.i.l.bf16 %v5162_v42  ;;  %v5169_v45 = vpop.permute.xlu1 %3325  ;;  %v2602_v53 = vpack.c.bf16 %v1313_v50, %v1310_v30 }
 0x2f8   : > { %v3328_v31 = vunpack.i.h.bf16 %v5169_v45  ;;  %v3327_v34 = vunpack.i.l.bf16 %v5169_v45 }
 0x2f9   : > { %2603 = vmatprep.subr.bf16.mxu0 %v2602_v53  ;;  %v1427_v24 = vsel %vm1403_vm7, %v3332_v1, %v3333_v35 }
 0x2fa   : > { %2605 = vmatpush1.bf16.msra.mxu0 %v2604_v56  ;;  %v3341_v23 = vpop.permute.xlu0 %3340  ;;  %v1424_v14 = vsel %vm1403_vm7, %v3327_v34, %v3328_v31 }
 0x2fb   : > { %v3343_v15 = vunpack.i.h.bf16 %v3341_v23  ;;  %v3342_v49 = vunpack.i.l.bf16 %v3341_v23  ;;  %v3336_v28 = vpop.permute.xlu1 %3335  ;;  %v2698_v6 = vpack.c.bf16 %v1427_v24, %v1424_v14 }
 0x2fc   : > { %v3338_v33 = vunpack.i.h.bf16 %v3336_v28  ;;  %v3337_v58 = vunpack.i.l.bf16 %v3336_v28 }
 0x2fd   : > { %v1404_v30 = vsel %vm1403_vm7, %v2912_v61, %v3342_v49  ;;  %v1407_v25 = vsel %vm1403_vm7, %v2913_v17, %v3343_v15  ;;  %2699 = vmatprep.subr.bf16.mxu1 %v2698_v6  ;;  %v1405_v50 = vsel %vm1403_vm7, %v3342_v49, %v3252_v59  ;;  %v1408_v56 = vsel %vm1403_vm7, %v3343_v15, %v3257_v44  ;;  %v5561_v49 = vld [vmem:[#allocation34_spill] sm:$0xff] }
 0x2fe   : > { %v2608_v35 = vpack.c.bf16 %v1407_v25, %v1404_v30  ;;  %v1198_v53 = vsel %vm1177_vm5, %v3228_v22, %v3337_v58  ;;  %v1201_v31 = vsel %vm1177_vm5, %v3233_v12, %v3338_v33  ;;  %v5195_v24 = vpop.permute.xlu0 %3345  ;;  %v2606_v0 = vpack.c.bf16 %v1408_v56, %v1405_v50 }
 0x2ff   : > { %v2700_v17 = vpack.c.bf16 %v1201_v31, %v1198_v53  ;;  %v3348_v27 = vunpack.i.h.bf16 %v5195_v24  ;;  %v3347_v59 = vunpack.i.l.bf16 %v5195_v24  ;;  %v5199_v32 = vpop.permute.xlu1 %3350  ;;  %v2918_v28 = vunpack.i.h.bf16 %v5561_v49 }
 0x300   : > { %v3353_v44 = vunpack.i.h.bf16 %v5199_v32  ;;  %v3352_v39 = vunpack.i.l.bf16 %v5199_v32  ;;  %2607 = vmatprep.subr.bf16.mxu0 %v2606_v0  ;;  %v2917_v6 = vunpack.i.l.bf16 %v5561_v49  ;;  %v5566_v32 = vld [vmem:[#allocation24_spill] sm:$0xff] }
 0x301   : > { %2701 = vmatpush3.bf16.msra.mxu1 %v2700_v17  ;;  %2609 = vmatpush1.bf16.msra.mxu0 %v2608_v35  ;;  %v1519_v5 = vsel %vm1516_vm8, %v3347_v59, %v3348_v27 }
 0x302   : > { %v3356_v12 = vpop.permute.xlu0 %3355  ;;  %v1522_v22 = vsel %vm1516_vm8, %v3352_v39, %v3353_v44 }
 0x303   : > { %v3358_v23 = vunpack.i.h.bf16 %v3356_v12  ;;  %v3357_v14 = vunpack.i.l.bf16 %v3356_v12  ;;  %v3361_v61 = vpop.permute.xlu1 %3360  ;;  %v2702_v15 = vpack.c.bf16 %v1522_v22, %v1519_v5 }
 0x304   : > { %v3363_v33 = vunpack.i.h.bf16 %v3361_v61  ;;  %v3362_v58 = vunpack.i.l.bf16 %v3361_v61 }
 0x305   : > { %v1293_v30 = vsel %vm1290_vm6, %v3243_v26, %v3357_v14  ;;  %v1296_v25 = vsel %vm1290_vm6, %v3248_v29, %v3358_v23  ;;  %2703 = vmatprep.subr.bf16.mxu1 %v2702_v15 }
 0x306   : > { %v2704_v50 = vpack.c.bf16 %v1296_v25, %v1293_v30  ;;  %v1413_v56 = vsel %vm1403_vm7, %v2918_v28, %v3363_v33  ;;  %v1410_v35 = vsel %vm1403_vm7, %v2917_v6, %v3362_v58  ;;  %v5219_v53 = vpop.permute.xlu0 %3370  ;;  %v1411_v31 = vsel %vm1403_vm7, %v3362_v58, %v3277_v52  ;;  %v5562_v52 = vld [vmem:[#allocation21_spill] sm:$0xff] }
 0x307   : > { %v2612_v0 = vpack.c.bf16 %v1413_v56, %v1410_v35  ;;  %v3373_v8 = vunpack.i.h.bf16 %v5219_v53  ;;  %v3372_v26 = vunpack.i.l.bf16 %v5219_v53  ;;  %v5226_v48 = vpop.permute.xlu1 %3365  ;;  %v1414_v29 = vsel %vm1403_vm7, %v3363_v33, %v3282_v41 }
 0x308   : > { %v3368_v17 = vunpack.i.h.bf16 %v5226_v48  ;;  %v3367_v27 = vunpack.i.l.bf16 %v5226_v48  ;;  %v2610_v44 = vpack.c.bf16 %v1414_v29, %v1411_v31  ;;  %2705 = vmatpush3.bf16.msra.mxu1 %v2704_v50  ;;  %v2923_v5 = vunpack.i.h.bf16 %v5562_v52 }
 0x309   : > { %v1528_v7 = vsel %vm1516_vm8, %v3372_v26, %v3373_v8  ;;  %v2922_v41 = vunpack.i.l.bf16 %v5562_v52 }
 0x30a   : > { %2611 = vmatprep.subr.bf16.mxu0 %v2610_v44  ;;  %v3381_v12 = vpop.permute.xlu0 %3380  ;;  %v1525_v2 = vsel %vm1516_vm8, %v3367_v27, %v3368_v17  ;;  %v5563_v44 = vld [vmem:[#allocation36_spill] sm:$0xff] }
 0x30b   : > { %2613 = vmatpush1.bf16.msra.mxu0 %v2612_v0  ;;  %v3383_v22 = vunpack.i.h.bf16 %v3381_v12  ;;  %v3382_v23 = vunpack.i.l.bf16 %v3381_v12  ;;  %v3376_v14 = vpop.permute.xlu1 %3375  ;;  %v2706_v61 = vpack.c.bf16 %v1528_v7, %v1525_v2  ;;  %v2928_v7 = vunpack.i.h.bf16 %v5563_v44 }
 0x30c   : > { %v3378_v15 = vunpack.i.h.bf16 %v3376_v14  ;;  %v3377_v49 = vunpack.i.l.bf16 %v3376_v14  ;;  %v2927_v52 = vunpack.i.l.bf16 %v5563_v44 }
 0x30d   : > { %v1416_v28 = vsel %vm1403_vm7, %v2922_v41, %v3382_v23  ;;  %v1419_v6 = vsel %vm1403_vm7, %v2923_v5, %v3383_v22  ;;  %2707 = vmatprep.subr.bf16.mxu1 %v2706_v61  ;;  %v1417_v33 = vsel %vm1403_vm7, %v3382_v23, %v3302_v43  ;;  %v1420_v58 = vsel %vm1403_vm7, %v3383_v22, %v3307_v9 }
 0x30e   : > { %v2616_v30 = vpack.c.bf16 %v1419_v6, %v1416_v28  ;;  %v1299_v25 = vsel %vm1290_vm6, %v3268_v10, %v3377_v49  ;;  %v1302_v50 = vsel %vm1290_vm6, %v3273_v57, %v3378_v15  ;;  %v5255_v56 = vpop.permute.xlu0 %3385  ;;  %v2614_v35 = vpack.c.bf16 %v1420_v58, %v1417_v33 }
 0x30f   : > { %v2708_v31 = vpack.c.bf16 %v1302_v50, %v1299_v25  ;;  %v3388_v19 = vunpack.i.h.bf16 %v5255_v56  ;;  %v3387_v43 = vunpack.i.l.bf16 %v5255_v56  ;;  %v5259_v47 = vpop.permute.xlu1 %3390 }
 0x310   : > { %v3393_v9 = vunpack.i.h.bf16 %v5259_v47  ;;  %v3392_v36 = vunpack.i.l.bf16 %v5259_v47  ;;  %2615 = vmatprep.subr.bf16.mxu0 %v2614_v35 }
 0x311   : > { %2709 = vmatpush3.bf16.msra.mxu1 %v2708_v31  ;;  %2617 = vmatpush1.bf16.msra.mxu0 %v2616_v30  ;;  %v1531_v37 = vsel %vm1516_vm8, %v3387_v43, %v3388_v19  ;;  %v5565_v19 = vld [vmem:[#allocation38_spill] sm:$0xff] }
 0x312   : > { %v3396_v57 = vpop.permute.xlu0 %3395  ;;  %v1534_v10 = vsel %vm1516_vm8, %v3392_v36, %v3393_v9  ;;  %v2938_v9 = vunpack.i.h.bf16 %v5565_v19 }
 0x313   : > { %v3398_v0 = vunpack.i.h.bf16 %v3396_v57  ;;  %v3397_v8 = vunpack.i.l.bf16 %v3396_v57  ;;  %v3401_v29 = vpop.permute.xlu1 %3400  ;;  %v2710_v17 = vpack.c.bf16 %v1534_v10, %v1531_v37  ;;  %v2937_v37 = vunpack.i.l.bf16 %v5565_v19 }
 0x314   : > { %v3403_v5 = vunpack.i.h.bf16 %v3401_v29  ;;  %v3402_v12 = vunpack.i.l.bf16 %v3401_v29 }
 0x315   : > { %v1305_v2 = vsel %vm1290_vm6, %v3293_v21, %v3397_v8  ;;  %v1308_v41 = vsel %vm1290_vm6, %v3298_v40, %v3398_v0  ;;  %2711 = vmatprep.subr.bf16.mxu1 %v2710_v17 }
 0x316   : > { %v2712_v22 = vpack.c.bf16 %v1308_v41, %v1305_v2  ;;  %v1425_v23 = vsel %vm1403_vm7, %v2928_v7, %v3403_v5  ;;  %v1422_v14 = vsel %vm1403_vm7, %v2927_v52, %v3402_v12  ;;  %v5279_v61 = vpop.permute.xlu0 %3410  ;;  %v1423_v15 = vsel %vm1403_vm7, %v3402_v12, %v3327_v34  ;;  %v5564_v34 = vld [vmem:[#allocation22_spill] sm:$0xff] }
 0x317   : > { %v2620_v49 = vpack.c.bf16 %v1425_v23, %v1422_v14  ;;  %v3413_v20 = vunpack.i.h.bf16 %v5279_v61  ;;  %v3412_v21 = vunpack.i.l.bf16 %v5279_v61  ;;  %v5286_v4 = vpop.permute.xlu1 %3405  ;;  %v1426_v40 = vsel %vm1403_vm7, %v3403_v5, %v3332_v1 }
 0x318   : > { %v3408_v28 = vunpack.i.h.bf16 %v5286_v4  ;;  %v3407_v6 = vunpack.i.l.bf16 %v5286_v4  ;;  %v2618_v33 = vpack.c.bf16 %v1426_v40, %v1423_v15  ;;  %2713 = vmatpush3.bf16.msra.mxu1 %v2712_v22  ;;  %v2933_v58 = vunpack.i.h.bf16 %v5564_v34 }
 0x319   : > { %v1540_v45 = vsel %vm1516_vm8, %v3412_v21, %v3413_v20  ;;  %v2932_v1 = vunpack.i.l.bf16 %v5564_v34  ;;  %v5567_v15 = vunpack.i.h.bf16 %v4708_v55  ;;  %v5568_v20 = vunpack.i.h.bf16 %v4605_v38 }
 0x31a   : > { %2619 = vmatprep.subr.bf16.mxu0 %v2618_v33  ;;  %v3421_v30 = vpop.permute.xlu0 %3420  ;;  %v1537_v42 = vsel %vm1516_vm8, %v3407_v6, %v3408_v28  ;;  %v3689_v33 = vmov 0.0|0.0   ;;  %v2942_v55 = vunpack.i.l.bf16 %v5566_v32  ;;  %v5569_v38 = vunpack.i.h.bf16 %v4730_v60 }
 0x31b   : > { %2621 = vmatpush1.bf16.msra.mxu0 %v2620_v49  ;;  %v3423_v25 = vunpack.i.h.bf16 %v3421_v30  ;;  %v3422_v50 = vunpack.i.l.bf16 %v3421_v30  ;;  %v3416_v35 = vpop.permute.xlu1 %3415  ;;  %v2714_v31 = vpack.c.bf16 %v1540_v45, %v1537_v42 }
 0x31c   : > { %v3418_v57 = vunpack.i.h.bf16 %v3416_v35  ;;  %v3417_v10 = vunpack.i.l.bf16 %v3416_v35 }
 0x31d   : > { %v1517_v0 = vsel %vm1516_vm8, %v2932_v1, %v3422_v50  ;;  %v1520_v8 = vsel %vm1516_vm8, %v2933_v58, %v3423_v25  ;;  %2715 = vmatprep.subr.bf16.mxu1 %v2714_v31  ;;  %v1518_v29 = vsel %vm1516_vm8, %v3422_v50, %v3347_v59  ;;  %v1521_v17 = vsel %vm1516_vm8, %v3423_v25, %v3352_v39 }
 0x31e   : > { %v2624_v44 = vpack.c.bf16 %v1520_v8, %v1517_v0  ;;  %v1311_v7 = vsel %vm1290_vm6, %v3318_v11, %v3417_v10  ;;  %v1314_v52 = vsel %vm1290_vm6, %v3323_v46, %v3418_v57  ;;  %v3426_v5 = vpop.permute.xlu0 %3425  ;;  %v2622_v12 = vpack.c.bf16 %v1521_v17, %v1518_v29  ;;  %v5320_v11 = vld [vmem:[#allocation8 + $0x10] sm:$0xff] }
 0x31f   : > { %v2716_v2 = vpack.c.bf16 %v1314_v52, %v1311_v7  ;;  %v3428_v41 = vunpack.i.h.bf16 %v3426_v5  ;;  %v3427_v24 = vunpack.i.l.bf16 %v3426_v5  ;;  %v3431_v22 = vpop.permute.xlu1 %3430  ;;  %v2943_v39 = vunpack.i.h.bf16 %v5566_v32 }
 0x320   : > { %v3433_v59 = vunpack.i.h.bf16 %v3431_v22  ;;  %v3432_v23 = vunpack.i.l.bf16 %v3431_v22  ;;  %2623 = vmatprep.subr.bf16.mxu0 %v2622_v12  ;;  %v5570_v50 = vunpack.i.h.bf16 %v4611_v54  ;;  %v5571_v54 = vmov 0.0  }
 0x321   : > { %v1523_v14 = vsel %vm1516_vm8, %v2937_v37, %v3427_v24  ;;  %v1526_v51 = vsel %vm1516_vm8, %v2938_v9, %v3428_v41  ;;  %2717 = vmatpush3.bf16.msra.mxu1 %v2716_v2  ;;  %2625 = vmatpush1.bf16.msra.mxu0 %v2624_v44  ;;  %v1524_v18 = vsel %vm1516_vm8, %v3427_v24, %v3367_v27  ;;  %v5573_v52 = vunpack.i.h.bf16 %v4625_v13 }
 0x322   : > { %v2628_v46 = vpack.c.bf16 %v1526_v51, %v1523_v14  ;;  %v1635_v49 = vsel %vm1629_vm2, %v5567_v15, %v3433_v59  ;;  %v1632_v40 = vsel %vm1629_vm2, %v5568_v20, %v3432_v23  ;;  %v3441_v28 = vpop.permute.xlu0 %3440  ;;  %2718 = vmatprep.subr.bf16.mxu1 %v3689_v33  ;;  %v1527_v45 = vsel %vm1516_vm8, %v3428_v41, %v3372_v26 }
 0x323   : > { %v2719_v34 = vpack.c.bf16 %v1635_v49, %v1632_v40  ;;  %v3443_v48 = vunpack.i.h.bf16 %v3441_v28  ;;  %v3442_v58 = vunpack.i.l.bf16 %v3441_v28  ;;  %v3436_v27 = vpop.permute.xlu1 %3435  ;;  %v2626_v30 = vpack.c.bf16 %v1527_v45, %v1524_v18 }
 0x324   : > { %v3438_v42 = vunpack.i.h.bf16 %v3436_v27  ;;  %v3437_v1 = vunpack.i.l.bf16 %v3436_v27  ;;  %2041 = vmatmul.mubr.f32.vlgmr.msra.gmra.mrb[6].mxu1 %v5320_v11  ;;  %v5574_v24 = vunpack.i.h.bf16 %v4775_v63  ;;  %v5575_v59 = vunpack.i.h.bf16 %v4645_v16 }
 0x325   : > { %v1638_v25 = vsel %vm1629_vm2, %v5569_v38, %v3442_v58  ;;  %v1641_v53 = vsel %vm1629_vm2, %v5570_v50, %v3443_v48  ;;  %2627 = vmatprep.subr.bf16.mxu0 %v2626_v30  ;;  %2720 = vmatpush3.bf16.msra.mxu1 %v2719_v34 }
 0x326   : > { %v2722_v26 = vpack.c.bf16 %v1641_v53, %v1638_v25  ;;  %v1529_v35 = vsel %vm1516_vm8, %v2942_v55, %v3437_v1  ;;  %v1532_v31 = vsel %vm1516_vm8, %v2943_v39, %v3438_v42  ;;  %2629 = vmatpush1.bf16.msra.mxu0 %v2628_v46  ;;  %v3446_v19 = vpop.permute.xlu0 %3445  ;;  %2721 = vmatprep.subr.bf16.mxu1 %v3689_v33 }
 0x327   : > { %v3448_v9 = vunpack.i.h.bf16 %v3446_v19  ;;  %v3447_v37 = vunpack.i.l.bf16 %v3446_v19  ;;  %v3456_v57 = vpop.permute.xlu1 %3455  ;;  %v1530_v60 = vsel %vm1516_vm8, %v3437_v1, %v3387_v43  ;;  %2379 = vmatprep.mubr.msk.f32.mxu1 %vm3690_vm9, %v5571_v54  ;;  %v2632_v10 = vpack.c.bf16 %v1532_v31, %v1529_v35 }
 0x328   : > { %v3458_v0 = vunpack.i.h.bf16 %v3456_v57  ;;  %v3457_v8 = vunpack.i.l.bf16 %v3456_v57  ;;  %v1533_v29 = vsel %vm1516_vm8, %v3438_v42, %v3392_v36  ;;  %v5572_v43 = vunpack.i.h.bf16 %v4752_v62 }
 0x329   : > { %v2630_v17 = vpack.c.bf16 %v1533_v29, %v1530_v60  ;;  %2723 = vmatpush3.bf16.msra.mxu1 %v2722_v26  ;;  %v1536_v44 = vsel %vm1516_vm8, %v3447_v37, %v3407_v6  ;;  %v1539_v56 = vsel %vm1516_vm8, %v3448_v9, %v3412_v21 }
 0x32a   : > { %v1647_v7 = vsel %vm1629_vm2, %v5572_v43, %v3458_v0  ;;  %v1644_v47 = vsel %vm1629_vm2, %v5573_v52, %v3457_v8  ;;  %v3451_v5 = vpop.permute.xlu0 %3450  ;;  %2724 = vmatprep.subr.bf16.mxu1 %v3689_v33  ;;  %v2634_v36 = vpack.c.bf16 %v1539_v56, %v1536_v44 }
 0x32b   : > { %v2725_v12 = vpack.c.bf16 %v1647_v7, %v1644_v47  ;;  %2631 = vmatprep.subr.bf16.mxu0 %v2630_v17  ;;  %v3453_v4 = vunpack.i.h.bf16 %v3451_v5  ;;  %v3452_v2 = vunpack.i.l.bf16 %v3451_v5  ;;  %v3461_v6 = vpop.permute.xlu1 %3460 }
 0x32c   : > { %2633 = vmatpush1.bf16.msra.mxu0 %v2632_v10  ;;  %v3463_v61 = vunpack.i.h.bf16 %v3461_v6  ;;  %v3462_v41 = vunpack.i.l.bf16 %v3461_v6 }
 0x32d   : > { %v1535_v21 = vsel %vm1516_vm8, %v3452_v2, %v3447_v37  ;;  %v1538_v62 = vsel %vm1516_vm8, %v3453_v4, %v3448_v9  ;;  %2635 = vmatprep.subr.bf16.mxu0 %v2634_v36  ;;  %2726 = vmatpush3.bf16.msra.mxu1 %v2725_v12 }
 0x32e   : > { %v2636_v13 = vpack.c.bf16 %v1538_v62, %v1535_v21  ;;  %v1650_v22 = vsel %vm1629_vm2, %v5574_v24, %v3462_v41  ;;  %v1653_v23 = vsel %vm1629_vm2, %v5575_v59, %v3463_v61  ;;  %2727 = vmatprep.subr.bf16.mxu1 %v3689_v33 }
 0x32f   : > { %v2728_v32 = vpack.c.bf16 %v1653_v23, %v1650_v22 }
 0x330   : > { %2637 = vmatpush1.bf16.msra.mxu0 %v2636_v13 }
 0x331   : > { %2729 = vmatpush3.bf16.msra.mxu1 %v2728_v32 }
 0x333   : > { %1829 = vmatmul.mubr.f32.vlgmr.msra.gmra.mrb[2].mxu0 %v5320_v11 }
 0x334   : > { %2380 = vmatmul.mubr.msk.f32.vlgmr.msra.gmra.mrb[8].mxu1 %vm1689_vm4, %v4823_v3 }
 0x33b   : > { %v1687_v46 = vpop.permute.xlu0 %1686 }
 0x393   : > { %v1901_v39 = vpop.f32.mrb[2].mxu1 }
 0x394   : > { %v1903_v14 = vpop.f32.mrb[3].mxu1 }
 0x3b5   : > { %v2316_v51 = vpop.f32.mrb[4].mxu1 }
 0x3b6   : > { %v2317_v18 = vpop.f32.mrb[5].mxu1 }
 0x3b7   : > { %v2318_v63 = vadd.f32 %v2317_v18, %v2316_v51 }
 0x3b9   : > { %v1973_v16 = vadd.f32 %v2318_v63, %v1687_v46 }
 0x3f7   : > { %v2351_v15 = vpop.f32.mrb[6].mxu1 }
 0x3f8   : > { %v2352_v49 = vpop.f32.mrb[7].mxu1 }
 0x3f9   : > { %v2353_v20 = vadd.f32 %v2352_v49, %v2351_v15 }
 0x3fb   : > { %v2043_v40 = vadd.f32 %v2353_v20, %v1973_v16 }
 0x406   : > { %v1830_v28 = vpop.f32.mrb[2].mxu0 }
 0x407   : > { %v2730_v33 = vadd.f32 %v1830_v28, %v1687_v46  ;;  %v2112_v45 = vpop.f32.mrb[8].mxu1  ;;  %v1832_v34 = vpop.f32.mrb[3].mxu0 }
 0x408   : > { %v2113_v48 = vadd.f32 %v2112_v45, %v2043_v40  ;;  %v2732_v11 = vadd.f32 %v1832_v34, %v1687_v46  ;;  %v2381_v58 = vpop.f32.mrb[9].mxu1 }
 0x409   : > { %v2731_v27 = vadd.f32 %v2730_v33, %v1901_v39 }
 0x40a   : > { %v2118_v3 = vsub.f32 0.0, %v2113_v48  ;;  %v2733_v30 = vadd.f32 %v2732_v11, %v1903_v14 }
 0x40b   : > { %v2116_v55 = vsub.f32 0.0, %v2731_v27 }
 0x40c   : > { %v2123_v42 = vmul.f32 1.442695, %v2118_v3  ;;  %v2117_v1 = vsub.f32 0.0, %v2733_v30 }
 0x40d   : > { %v2119_v38 = vmul.f32 1.442695, %v2116_v55 }
 0x40e   : > { %3465 = vpow2.f32 %v2123_v42  ;;  %v2121_v25 = vmul.f32 1.442695, %v2117_v1 }
 0x40f   : > { %3467 = vpow2.f32 %v2119_v38 }
 0x410   : > { %3469 = vpow2.f32 %v2121_v25 }
 0x418   : > { %v3466_v50 = vpop.eup %3465 }
 0x419   : > { %v3468_v53 = vpop.eup %3467  ;;  %v2127_v26 = vadd.f32 1.0, %v3466_v50 }
 0x41a   : > { %v3470_v35 = vpop.eup %3469  ;;  %v2125_v31 = vadd.f32 1.0, %v3468_v53 }
 0x41b   : > { %3471 = vrcp.f32 %v2127_v26  ;;  %v2126_v19 = vadd.f32 1.0, %v3470_v35 }
 0x41c   : > { %3473 = vrcp.f32 %v2125_v31 }
 0x41d   : > { %3475 = vrcp.f32 %v2126_v19 }
 0x425   : > { %v3472_v9 = vpop.eup %3471 }
 0x426   : > { %v3474_v37 = vpop.eup %3473  ;;  %2133 = vst [vmem:[%s305_s26 + $0x10] sm:$0xff] %v3472_v9 }
 0x427   : > { %v3476_v57 = vpop.eup %3475  ;;  %2131 = vst [vmem:[%s305_s26] sm:$0xff] %v3474_v37 }
 0x428   : > { %2132 = vst [vmem:[%s305_s26 + $0x8] sm:$0xff] %v3476_v57 }
 0x429   : > { %3606 = shalt.err (!%p3603_p7)
}
 0x42a   : > { %s3607_s0 = scalar_lea.hbm %s5379_s24, 384  ;;  %s3611_s27 = scalar_lea.hbm %s5428_s5, 768 }
 0x42b   : > { %p3608_p1 = scmp.ne.s32.totalorder %s5379_s24, %s3607_s0  ;;  %p3612_p0 = scmp.lt.u32.totalorder %s5379_s24, %s5428_s5 }
 0x42c   : > { %p3613_p9 = scmp.lt.u32.totalorder %s3611_s27, %s3607_s0  ;;  %p3615_p2 = scmp.lt.u32.totalorder %s3607_s0, %s5379_s24 }
 0x42d   : > { %p3609_p8 = pnand %p3608_p1, %p5576_p13 }
 0x42e   : > { %p3614_p12 = por %p3613_p9, %p3612_p0 }
 0x42f   : > { %p3610_p11 = pneg %p3609_p8 }
 0x430   : > { %p3616_p6 = por %p3615_p2, %p3614_p12 }
 0x432   : > { %p3617_p10 = pnand %p3616_p6, %p3610_p11 }
 0x434   : > { %3620 = shalt.err (!%p3617_p10)
}
 0x435   : > { %2750 = dma.vmem_to_hbm [thread:$0]  (%p5576_p13), %s5381_s11, 384, %s5379_s24, %s2135_s30  }
 0x436 PF: > { %s2161_s8 = sand.u32 1, %s3659_s18   ;;  %p5577_p4 = scmp.ne.s32.totalorder %s5477_s25, 0 }
 0x437   : > { %p5578_p5 = scmp.ge.s32.totalorder %s3671_s21, 2  ;;  %s2162_s10 = scalar_lea.sflag [#allocation4], %s2161_s8 }
 0x439   : > { %p2767_p3 = pnand %p5578_p5, %p5577_p4 }
 0x43b   : > { %3654 = dma.done.wait (!%p2767_p3), %s2162_s10, 384  }
 0x43c   : > { %3656 = vsyncadd (!%p2767_p3), %s2162_s10, 4294966912  ;;  %p22_p7 = scmp.ge.s32.totalorder %s3832_s14, 4   ;;  %s5579_s18 = smov %s3663_s19 }
 0x43d   : > { %s5580_s19 = smov %s3667_s20  ;;  %s5581_s20 = smov %s3848_s17 }
 0x43e   : > { %s5582_s21 = smov %s3832_s14  ;;  %24 = sbr.rel (!%p22_p7) target bundleno = 10 (0xa), region = 106 }
 0x445   :  { %2167 = vsyncpa [#allocation3], 1 }
 0x446   :  { %2169 = vsyncpa [#allocation3 + $0x1], 1 }
 0x447   :  { %2170 = vsyncpa [#allocation6], 1 }
 0x448   :  { %2172 = vsyncpa [#allocation6 + $0x1], 1 }
 0x449   :  { %2173 = vsyncpa [#allocation9], 1 }
 0x44a   :  { %2174 = vsyncpa [#allocation4], 1 }
 0x44b   :  { %2176 = vsyncpa [#allocation4 + $0x1], 1 }

</bundles_post_ra>
